<compile_context>
chip_gen: v7x
topology: tpu7x:2x2x1
jax: 0.10.0
libtpu: 0.0.40
codegen_flags: <defaults>
</compile_context>

<pallas_src>
import functools

import jax
import jax.numpy as jnp
import numpy as np
from jax.experimental import pallas as pl
from jax.experimental.pallas import tpu as pltpu

# Architecture constants (from the PyTorch __init__)
K1, K2, K3 = 1, 7, 15
C_IN, C1, C2, C3 = 2, 50, 11, 3
PAD2 = (K2 - 1) // 2
PAD3 = (K3 - 1) // 2


def _convnet_kernel(x_ref, w1_ref, b1_ref, w2_ref, b2_ref, w3_ref, b3_ref,
                    out_ref, *, H):
    R = x_ref.shape[0]                       # rows in this block = TB * H
    # Row position within each length-H sequence (blocks always hold whole sequences,
    # so row % H is the position along the conv axis and masks the SAME zero padding
    # as well as any cross-sequence bleed from the circular roll).
    l_idx = jax.lax.broadcasted_iota(jnp.int32, (R, 1), 0) % H

    def tap_conv(h, w_all_ref, b_ref, K, pad, relu):
        """SAME 1-D conv along rows. w_all is (C_in, K*C_out), tap-major on lanes:
        a single matmul produces every per-tap contribution; taps are then shifted
        into place with static sublane rolls (XLU) and edge-masked (zero padding)."""
        c_out = b_ref.shape[-1]
        y = jnp.dot(h, w_all_ref[...], preferred_element_type=jnp.float32)  # (R, K*c_out)
        acc = jnp.broadcast_to(b_ref[...], (R, c_out)).astype(jnp.float32)
        for t in range(K):
            piece = y[:, t * c_out:(t + 1) * c_out]
            shift = (pad - t) % R
            if shift:
                piece = pltpu.roll(piece, shift=shift, axis=0)
            if t == pad:
                acc = acc + piece            # zero shift, mask is all-true
            else:
                valid = (l_idx >= (pad - t)) & (l_idx < (H + pad - t))
                acc = acc + jnp.where(valid, piece, 0.0)
        return jnp.maximum(acc, 0.0) if relu else acc

    # ---- cnn1: (1,1) conv == one tall channel matmul + bias + ReLU ----
    h1 = jnp.dot(x_ref[...], w1_ref[...], preferred_element_type=jnp.float32)
    h1 = jnp.maximum(h1 + b1_ref[...], 0.0)
    # TODO(synk): nn.Dropout(p=0.3) is identity in eval mode; training-mode stochastic
    # dropout (pltpu.prng_*) is not implemented here.

    # ---- cnn2: (7,1) SAME conv + ReLU ----
    h2 = tap_conv(h1, w2_ref, b2_ref, K2, PAD2, relu=True)

    # ---- cnn3: (15,1) SAME conv ----
    h3 = tap_conv(h2, w3_ref, b3_ref, K3, PAD3, relu=False)

    # ---- log_softmax over channels (PyTorch dim=1 == last dim in this layout) ----
    m = jnp.max(h3, axis=-1, keepdims=True)
    z = h3 - m
    lse = jnp.log(jnp.sum(jnp.exp(z), axis=-1, keepdims=True))
    out_ref[...] = (z - lse).astype(out_ref.dtype)


def _choose_tb(B, H, target_rows=512):
    """Batch elements per grid block: big enough to amortize per-step overhead and
    fill the MXU M dimension, while keeping a clean sublane-aligned tiling."""
    tb = max(1, min(B, max(1, target_rows // H)))
    while tb > 1 and (B % tb != 0 or (tb * H) % 8 != 0):
        tb -= 1
    if B % tb != 0 or (tb * H) % 8 != 0:
        tb = B  # single block == full array (always a legal block shape)
    return tb


def init_params(key):
    """Deterministic, PyTorch-Conv2d-style uniform(-1/sqrt(fan_in), 1/sqrt(fan_in)) init."""
    ks = jax.random.split(key, 6)

    def u(k, shape, fan_in):
        bound = 1.0 / float(np.sqrt(fan_in))
        return jax.random.uniform(k, shape, jnp.float32, -bound, bound)

    return dict(
        w1=u(ks[0], (C1, C_IN, K1, 1), C_IN * K1),  # OIHW
        b1=u(ks[1], (C1,), C_IN * K1),
        w2=u(ks[2], (C2, C1, K2, 1), C1 * K2),
        b2=u(ks[3], (C2,), C1 * K2),
        w3=u(ks[4], (C3, C2, K3, 1), C2 * K3),
        b3=u(ks[5], (C3,), C2 * K3),
    )


@jax.jit
def convnet_forward(x_nchw, params):
    N, Cin, H, W = x_nchw.shape
    B = N * W

    # NCHW -> (B*H, C): conv axis on sublanes (whole sequences contiguous), channels on lanes.
    x2d = jnp.transpose(x_nchw, (0, 3, 2, 1)).reshape(B * H, Cin).astype(jnp.float32)

    # Repack PyTorch OIHW weights:
    #   cnn1 (1x1): (C_IN, C1)
    #   cnn2/cnn3: taps concatenated along the OUTPUT axis, tap-major:
    #              W_all[c, t*C_out + o] = W[o, c, t, 0]  -> one matmul per conv layer.
    w1 = params["w1"][:, :, 0, 0].T.astype(jnp.float32)                                      # (C_IN, C1)
    w2 = jnp.transpose(params["w2"][:, :, :, 0], (1, 2, 0)).reshape(C1, K2 * C2).astype(jnp.float32)
    w3 = jnp.transpose(params["w3"][:, :, :, 0], (1, 2, 0)).reshape(C2, K3 * C3).astype(jnp.float32)
    b1 = params["b1"].reshape(1, C1).astype(jnp.float32)
    b2 = params["b2"].reshape(1, C2).astype(jnp.float32)
    b3 = params["b3"].reshape(1, C3).astype(jnp.float32)

    TB = _choose_tb(B, H)          # batch elements per grid step
    R = TB * H                     # rows per block
    grid = (B // TB,)

    out = pl.pallas_call(
        functools.partial(_convnet_kernel, H=H),
        out_shape=jax.ShapeDtypeStruct((B * H, C3), jnp.float32),
        grid_spec=pltpu.PrefetchScalarGridSpec(
            num_scalar_prefetch=0,
            grid=grid,
            in_specs=[
                pl.BlockSpec((R, Cin), lambda i: (i, 0)),
                pl.BlockSpec((C_IN, C1), lambda i: (0, 0)),
                pl.BlockSpec((1, C1), lambda i: (0, 0)),
                pl.BlockSpec((C1, K2 * C2), lambda i: (0, 0)),
                pl.BlockSpec((1, C2), lambda i: (0, 0)),
                pl.BlockSpec((C2, K3 * C3), lambda i: (0, 0)),
                pl.BlockSpec((1, C3), lambda i: (0, 0)),
            ],
            # Output last dim is C3=3 (full extent); with batching the whole block
            # writes back as a single DMA, so the narrow lane width is negligible here.
            out_specs=pl.BlockSpec((R, C3), lambda i: (i, 0)),
        ),
        # Batch blocks are fully independent -> let v7x shard the grid across its 2 TCs.
        compiler_params=pltpu.CompilerParams(dimension_semantics=("parallel",)),
    )(x2d, w1, b1, w2, b2, w3, b3)

    # (B*H, C3) -> NCHW
    return out.reshape(N, W, H, C3).transpose(0, 3, 2, 1)


def ref_forward(x, p):
    """Pure-JAX reference (matches PyTorch eval-mode forward)."""
    def conv(y, w, b, pad):
        o = jax.lax.conv_general_dilated(
            y, w, (1, 1), [(pad, pad), (0, 0)],
            dimension_numbers=("NCHW", "OIHW", "NCHW"),
            precision=jax.lax.Precision.HIGHEST)
        return o + b.reshape(1, -1, 1, 1)

    h = jax.nn.relu(conv(x, p["w1"], p["b1"], 0))
    h = jax.nn.relu(conv(h, p["w2"], p["b2"], PAD2))
    h = conv(h, p["w3"], p["b3"], PAD3)
    return jax.nn.log_softmax(h, axis=1)


if __name__ == "__main__":
    key = jax.random.PRNGKey(0)
    pkey, xkey = jax.random.split(key)
    params = init_params(pkey)

    # Small shapes consistent with the module: N=2, C=2 (cnn1 in_channels), H=16, W=1
    x = jax.random.normal(xkey, (2, 2, 16, 1), jnp.float32)

    out = convnet_forward(x, params)
    out = jax.block_until_ready(out)
    assert out.shape == (2, 3, 16, 1)

    ref = ref_forward(x, params)
    np.testing.assert_allclose(np.asarray(out), np.asarray(ref), atol=1e-4, rtol=1e-4)

    print("KERNEL_OK")
</pallas_src>

<mosaic_0001>
module attributes {stable_mosaic.version = 11 : i64} {
  func.func @_convnet_kernel(%arg0: i32, %arg1: memref<32x2xf32, #tpu.memory_space<vmem>>, %arg2: memref<2x50xf32, #tpu.memory_space<vmem>>, %arg3: memref<1x50xf32, #tpu.memory_space<vmem>>, %arg4: memref<50x77xf32, #tpu.memory_space<vmem>>, %arg5: memref<1x11xf32, #tpu.memory_space<vmem>>, %arg6: memref<11x45xf32, #tpu.memory_space<vmem>>, %arg7: memref<1x3xf32, #tpu.memory_space<vmem>>, %arg8: memref<32x3xf32, #tpu.memory_space<vmem>>) attributes {dimension_semantics = [#tpu.dimension_semantics<parallel>], iteration_bounds = array<i64: 1>, scalar_prefetch = 0 : i64, scratch_operands = 0 : i64, tpu.core_type = #tpu.core_type<tc>, window_params = [{transform_indices = @transform_0, window_bounds = array<i64: 32, 2>}, {pipeline_mode = #tpu.pipeline_mode<synchronous>, transform_indices = @transform_1, window_bounds = array<i64: 2, 50>}, {pipeline_mode = #tpu.pipeline_mode<synchronous>, transform_indices = @transform_2, window_bounds = array<i64: 1, 50>}, {pipeline_mode = #tpu.pipeline_mode<synchronous>, transform_indices = @transform_3, window_bounds = array<i64: 50, 77>}, {pipeline_mode = #tpu.pipeline_mode<synchronous>, transform_indices = @transform_4, window_bounds = array<i64: 1, 11>}, {pipeline_mode = #tpu.pipeline_mode<synchronous>, transform_indices = @transform_5, window_bounds = array<i64: 11, 45>}, {pipeline_mode = #tpu.pipeline_mode<synchronous>, transform_indices = @transform_6, window_bounds = array<i64: 1, 3>}, {transform_indices = @transform_7, window_bounds = array<i64: 32, 3>}]} {
    %0 = tpu.iota {dimensions = array<i32: 0>} : vector<32x1xi32>
    %c16_i32 = arith.constant 16 : i32
    %c0_i32 = arith.constant 0 : i32
    %1 = arith.cmpi eq, %c16_i32, %c0_i32 : i32
    %c1_i32 = arith.constant 1 : i32
    %2 = arith.select %1, %c1_i32, %c16_i32 : i32
    %3 = vector.broadcast %2 : i32 to vector<32x1xi32>
    %4 = arith.remsi %0, %3 : vector<32x1xi32>
    %c0_i32_0 = arith.constant 0 : i32
    %5 = vector.broadcast %c0_i32_0 : i32 to vector<32x1xi32>
    %6 = arith.cmpi ne, %4, %5 : vector<32x1xi32>
    %c0_i32_1 = arith.constant 0 : i32
    %7 = vector.broadcast %c0_i32_1 : i32 to vector<32x1xi32>
    %8 = arith.cmpi slt, %4, %7 : vector<32x1xi32>
    %c0_i32_2 = arith.constant 0 : i32
    %9 = arith.cmpi slt, %2, %c0_i32_2 : i32
    %10 = vector.broadcast %9 : i1 to vector<32x1xi1>
    %11 = vector.broadcast %10 : vector<32x1xi1> to vector<32x1xi1>
    %12 = arith.xori %8, %11 : vector<32x1xi1>
    %13 = arith.andi %12, %6 : vector<32x1xi1>
    %14 = vector.broadcast %2 : i32 to vector<32x1xi32>
    %15 = arith.addi %4, %14 : vector<32x1xi32>
    %16 = arith.select %13, %15, %4 : vector<32x1xi1>, vector<32x1xi32>
    %c0 = arith.constant 0 : index
    %c0_3 = arith.constant 0 : index
    %17 = vector.load %arg1[%c0, %c0_3] : memref<32x2xf32, #tpu.memory_space<vmem>>, vector<32x2xf32>
    %c0_4 = arith.constant 0 : index
    %c0_5 = arith.constant 0 : index
    %18 = vector.load %arg2[%c0_4, %c0_5] : memref<2x50xf32, #tpu.memory_space<vmem>>, vector<2x50xf32>
    %cst = arith.constant dense<0.000000e+00> : vector<32x50xf32>
    %19 = tpu.matmul %17, %18, %cst {dimension_numbers = #tpu.dot_dimension_numbers<[1], [0], [0], [1], [0, 0, 1, 1], [], []>} : vector<32x2xf32>, vector<2x50xf32>, vector<32x50xf32> -> vector<32x50xf32>
    %c0_6 = arith.constant 0 : index
    %c0_7 = arith.constant 0 : index
    %20 = vector.load %arg3[%c0_6, %c0_7] : memref<1x50xf32, #tpu.memory_space<vmem>>, vector<1x50xf32>
    %21 = vector.broadcast %20 : vector<1x50xf32> to vector<32x50xf32>
    %22 = arith.addf %19, %21 : vector<32x50xf32>
    %cst_8 = arith.constant 0.000000e+00 : f32
    %23 = vector.broadcast %cst_8 : f32 to vector<32x50xf32>
    %24 = arith.maximumf %22, %23 : vector<32x50xf32>
    %c0_9 = arith.constant 0 : index
    %c0_10 = arith.constant 0 : index
    %25 = vector.load %arg4[%c0_9, %c0_10] : memref<50x77xf32, #tpu.memory_space<vmem>>, vector<50x77xf32>
    %cst_11 = arith.constant dense<0.000000e+00> : vector<32x77xf32>
    %26 = tpu.matmul %24, %25, %cst_11 {dimension_numbers = #tpu.dot_dimension_numbers<[1], [0], [0], [1], [0, 0, 1, 1], [], []>} : vector<32x50xf32>, vector<50x77xf32>, vector<32x77xf32> -> vector<32x77xf32>
    %c0_12 = arith.constant 0 : index
    %c0_13 = arith.constant 0 : index
    %27 = vector.load %arg5[%c0_12, %c0_13] : memref<1x11xf32, #tpu.memory_space<vmem>>, vector<1x11xf32>
    %28 = vector.shape_cast %27 : vector<1x11xf32> to vector<1x11xf32>
    %29 = vector.broadcast %28 : vector<1x11xf32> to vector<32x11xf32>
    %30 = vector.extract_strided_slice %26 {offsets = [0, 0], sizes = [32, 11], strides = [1, 1]} : vector<32x77xf32> to vector<32x11xf32>
    %c3_i32 = arith.constant 3 : i32
    %31 = tpu.dynamic_rotate %30 by %c3_i32 dim 0 : vector<32x11xf32>, i32 -> vector<32x11xf32>
    %c3_i32_14 = arith.constant 3 : i32
    %32 = vector.broadcast %c3_i32_14 : i32 to vector<32x1xi32>
    %33 = arith.cmpi sge, %16, %32 : vector<32x1xi32>
    %c19_i32 = arith.constant 19 : i32
    %34 = vector.broadcast %c19_i32 : i32 to vector<32x1xi32>
    %35 = arith.cmpi slt, %16, %34 : vector<32x1xi32>
    %36 = arith.andi %33, %35 : vector<32x1xi1>
    %cst_15 = arith.constant 0.000000e+00 : f32
    %37 = vector.shape_cast %36 : vector<32x1xi1> to vector<32x1xi1>
    %38 = vector.broadcast %37 : vector<32x1xi1> to vector<32x11xi1>
    %39 = vector.broadcast %cst_15 : f32 to vector<32x11xf32>
    %40 = arith.select %38, %31, %39 : vector<32x11xi1>, vector<32x11xf32>
    %41 = arith.addf %29, %40 : vector<32x11xf32>
    %42 = vector.extract_strided_slice %26 {offsets = [0, 11], sizes = [32, 11], strides = [1, 1]} : vector<32x77xf32> to vector<32x11xf32>
    %c2_i32 = arith.constant 2 : i32
    %43 = tpu.dynamic_rotate %42 by %c2_i32 dim 0 : vector<32x11xf32>, i32 -> vector<32x11xf32>
    %c2_i32_16 = arith.constant 2 : i32
    %44 = vector.broadcast %c2_i32_16 : i32 to vector<32x1xi32>
    %45 = arith.cmpi sge, %16, %44 : vector<32x1xi32>
    %c18_i32 = arith.constant 18 : i32
    %46 = vector.broadcast %c18_i32 : i32 to vector<32x1xi32>
    %47 = arith.cmpi slt, %16, %46 : vector<32x1xi32>
    %48 = arith.andi %45, %47 : vector<32x1xi1>
    %cst_17 = arith.constant 0.000000e+00 : f32
    %49 = vector.shape_cast %48 : vector<32x1xi1> to vector<32x1xi1>
    %50 = vector.broadcast %49 : vector<32x1xi1> to vector<32x11xi1>
    %51 = vector.broadcast %cst_17 : f32 to vector<32x11xf32>
    %52 = arith.select %50, %43, %51 : vector<32x11xi1>, vector<32x11xf32>
    %53 = arith.addf %41, %52 : vector<32x11xf32>
    %54 = vector.extract_strided_slice %26 {offsets = [0, 22], sizes = [32, 11], strides = [1, 1]} : vector<32x77xf32> to vector<32x11xf32>
    %c1_i32_18 = arith.constant 1 : i32
    %55 = tpu.dynamic_rotate %54 by %c1_i32_18 dim 0 : vector<32x11xf32>, i32 -> vector<32x11xf32>
    %c1_i32_19 = arith.constant 1 : i32
    %56 = vector.broadcast %c1_i32_19 : i32 to vector<32x1xi32>
    %57 = arith.cmpi sge, %16, %56 : vector<32x1xi32>
    %c17_i32 = arith.constant 17 : i32
    %58 = vector.broadcast %c17_i32 : i32 to vector<32x1xi32>
    %59 = arith.cmpi slt, %16, %58 : vector<32x1xi32>
    %60 = arith.andi %57, %59 : vector<32x1xi1>
    %cst_20 = arith.constant 0.000000e+00 : f32
    %61 = vector.shape_cast %60 : vector<32x1xi1> to vector<32x1xi1>
    %62 = vector.broadcast %61 : vector<32x1xi1> to vector<32x11xi1>
    %63 = vector.broadcast %cst_20 : f32 to vector<32x11xf32>
    %64 = arith.select %62, %55, %63 : vector<32x11xi1>, vector<32x11xf32>
    %65 = arith.addf %53, %64 : vector<32x11xf32>
    %66 = vector.extract_strided_slice %26 {offsets = [0, 33], sizes = [32, 11], strides = [1, 1]} : vector<32x77xf32> to vector<32x11xf32>
    %67 = arith.addf %65, %66 : vector<32x11xf32>
    %68 = vector.extract_strided_slice %26 {offsets = [0, 44], sizes = [32, 11], strides = [1, 1]} : vector<32x77xf32> to vector<32x11xf32>
    %c31_i32 = arith.constant 31 : i32
    %69 = tpu.dynamic_rotate %68 by %c31_i32 dim 0 : vector<32x11xf32>, i32 -> vector<32x11xf32>
    %c-1_i32 = arith.constant -1 : i32
    %70 = vector.broadcast %c-1_i32 : i32 to vector<32x1xi32>
    %71 = arith.cmpi sge, %16, %70 : vector<32x1xi32>
    %c15_i32 = arith.constant 15 : i32
    %72 = vector.broadcast %c15_i32 : i32 to vector<32x1xi32>
    %73 = arith.cmpi slt, %16, %72 : vector<32x1xi32>
    %74 = arith.andi %71, %73 : vector<32x1xi1>
    %cst_21 = arith.constant 0.000000e+00 : f32
    %75 = vector.shape_cast %74 : vector<32x1xi1> to vector<32x1xi1>
    %76 = vector.broadcast %75 : vector<32x1xi1> to vector<32x11xi1>
    %77 = vector.broadcast %cst_21 : f32 to vector<32x11xf32>
    %78 = arith.select %76, %69, %77 : vector<32x11xi1>, vector<32x11xf32>
    %79 = arith.addf %67, %78 : vector<32x11xf32>
    %80 = vector.extract_strided_slice %26 {offsets = [0, 55], sizes = [32, 11], strides = [1, 1]} : vector<32x77xf32> to vector<32x11xf32>
    %c30_i32 = arith.constant 30 : i32
    %81 = tpu.dynamic_rotate %80 by %c30_i32 dim 0 : vector<32x11xf32>, i32 -> vector<32x11xf32>
    %c-2_i32 = arith.constant -2 : i32
    %82 = vector.broadcast %c-2_i32 : i32 to vector<32x1xi32>
    %83 = arith.cmpi sge, %16, %82 : vector<32x1xi32>
    %c14_i32 = arith.constant 14 : i32
    %84 = vector.broadcast %c14_i32 : i32 to vector<32x1xi32>
    %85 = arith.cmpi slt, %16, %84 : vector<32x1xi32>
    %86 = arith.andi %83, %85 : vector<32x1xi1>
    %cst_22 = arith.constant 0.000000e+00 : f32
    %87 = vector.shape_cast %86 : vector<32x1xi1> to vector<32x1xi1>
    %88 = vector.broadcast %87 : vector<32x1xi1> to vector<32x11xi1>
    %89 = vector.broadcast %cst_22 : f32 to vector<32x11xf32>
    %90 = arith.select %88, %81, %89 : vector<32x11xi1>, vector<32x11xf32>
    %91 = arith.addf %79, %90 : vector<32x11xf32>
    %92 = vector.extract_strided_slice %26 {offsets = [0, 66], sizes = [32, 11], strides = [1, 1]} : vector<32x77xf32> to vector<32x11xf32>
    %c29_i32 = arith.constant 29 : i32
    %93 = tpu.dynamic_rotate %92 by %c29_i32 dim 0 : vector<32x11xf32>, i32 -> vector<32x11xf32>
    %c-3_i32 = arith.constant -3 : i32
    %94 = vector.broadcast %c-3_i32 : i32 to vector<32x1xi32>
    %95 = arith.cmpi sge, %16, %94 : vector<32x1xi32>
    %c13_i32 = arith.constant 13 : i32
    %96 = vector.broadcast %c13_i32 : i32 to vector<32x1xi32>
    %97 = arith.cmpi slt, %16, %96 : vector<32x1xi32>
    %98 = arith.andi %95, %97 : vector<32x1xi1>
    %cst_23 = arith.constant 0.000000e+00 : f32
    %99 = vector.shape_cast %98 : vector<32x1xi1> to vector<32x1xi1>
    %100 = vector.broadcast %99 : vector<32x1xi1> to vector<32x11xi1>
    %101 = vector.broadcast %cst_23 : f32 to vector<32x11xf32>
    %102 = arith.select %100, %93, %101 : vector<32x11xi1>, vector<32x11xf32>
    %103 = arith.addf %91, %102 : vector<32x11xf32>
    %cst_24 = arith.constant 0.000000e+00 : f32
    %104 = vector.broadcast %cst_24 : f32 to vector<32x11xf32>
    %105 = arith.maximumf %103, %104 : vector<32x11xf32>
    %c0_25 = arith.constant 0 : index
    %c0_26 = arith.constant 0 : index
    %106 = vector.load %arg6[%c0_25, %c0_26] : memref<11x45xf32, #tpu.memory_space<vmem>>, vector<11x45xf32>
    %cst_27 = arith.constant dense<0.000000e+00> : vector<32x45xf32>
    %107 = tpu.matmul %105, %106, %cst_27 {dimension_numbers = #tpu.dot_dimension_numbers<[1], [0], [0], [1], [0, 0, 1, 1], [], []>} : vector<32x11xf32>, vector<11x45xf32>, vector<32x45xf32> -> vector<32x45xf32>
    %c0_28 = arith.constant 0 : index
    %c0_29 = arith.constant 0 : index
    %108 = vector.load %arg7[%c0_28, %c0_29] : memref<1x3xf32, #tpu.memory_space<vmem>>, vector<1x3xf32>
    %109 = vector.shape_cast %108 : vector<1x3xf32> to vector<1x3xf32>
    %110 = vector.broadcast %109 : vector<1x3xf32> to vector<32x3xf32>
    %111 = vector.extract_strided_slice %107 {offsets = [0, 0], sizes = [32, 3], strides = [1, 1]} : vector<32x45xf32> to vector<32x3xf32>
    %c7_i32 = arith.constant 7 : i32
    %112 = tpu.dynamic_rotate %111 by %c7_i32 dim 0 : vector<32x3xf32>, i32 -> vector<32x3xf32>
    %c7_i32_30 = arith.constant 7 : i32
    %113 = vector.broadcast %c7_i32_30 : i32 to vector<32x1xi32>
    %114 = arith.cmpi sge, %16, %113 : vector<32x1xi32>
    %c23_i32 = arith.constant 23 : i32
    %115 = vector.broadcast %c23_i32 : i32 to vector<32x1xi32>
    %116 = arith.cmpi slt, %16, %115 : vector<32x1xi32>
    %117 = arith.andi %114, %116 : vector<32x1xi1>
    %cst_31 = arith.constant 0.000000e+00 : f32
    %118 = vector.shape_cast %117 : vector<32x1xi1> to vector<32x1xi1>
    %119 = vector.broadcast %118 : vector<32x1xi1> to vector<32x3xi1>
    %120 = vector.broadcast %cst_31 : f32 to vector<32x3xf32>
    %121 = arith.select %119, %112, %120 : vector<32x3xi1>, vector<32x3xf32>
    %122 = arith.addf %110, %121 : vector<32x3xf32>
    %123 = vector.extract_strided_slice %107 {offsets = [0, 3], sizes = [32, 3], strides = [1, 1]} : vector<32x45xf32> to vector<32x3xf32>
    %c6_i32 = arith.constant 6 : i32
    %124 = tpu.dynamic_rotate %123 by %c6_i32 dim 0 : vector<32x3xf32>, i32 -> vector<32x3xf32>
    %c6_i32_32 = arith.constant 6 : i32
    %125 = vector.broadcast %c6_i32_32 : i32 to vector<32x1xi32>
    %126 = arith.cmpi sge, %16, %125 : vector<32x1xi32>
    %c22_i32 = arith.constant 22 : i32
    %127 = vector.broadcast %c22_i32 : i32 to vector<32x1xi32>
    %128 = arith.cmpi slt, %16, %127 : vector<32x1xi32>
    %129 = arith.andi %126, %128 : vector<32x1xi1>
    %cst_33 = arith.constant 0.000000e+00 : f32
    %130 = vector.shape_cast %129 : vector<32x1xi1> to vector<32x1xi1>
    %131 = vector.broadcast %130 : vector<32x1xi1> to vector<32x3xi1>
    %132 = vector.broadcast %cst_33 : f32 to vector<32x3xf32>
    %133 = arith.select %131, %124, %132 : vector<32x3xi1>, vector<32x3xf32>
    %134 = arith.addf %122, %133 : vector<32x3xf32>
    %135 = vector.extract_strided_slice %107 {offsets = [0, 6], sizes = [32, 3], strides = [1, 1]} : vector<32x45xf32> to vector<32x3xf32>
    %c5_i32 = arith.constant 5 : i32
    %136 = tpu.dynamic_rotate %135 by %c5_i32 dim 0 : vector<32x3xf32>, i32 -> vector<32x3xf32>
    %c5_i32_34 = arith.constant 5 : i32
    %137 = vector.broadcast %c5_i32_34 : i32 to vector<32x1xi32>
    %138 = arith.cmpi sge, %16, %137 : vector<32x1xi32>
    %c21_i32 = arith.constant 21 : i32
    %139 = vector.broadcast %c21_i32 : i32 to vector<32x1xi32>
    %140 = arith.cmpi slt, %16, %139 : vector<32x1xi32>
    %141 = arith.andi %138, %140 : vector<32x1xi1>
    %cst_35 = arith.constant 0.000000e+00 : f32
    %142 = vector.shape_cast %141 : vector<32x1xi1> to vector<32x1xi1>
    %143 = vector.broadcast %142 : vector<32x1xi1> to vector<32x3xi1>
    %144 = vector.broadcast %cst_35 : f32 to vector<32x3xf32>
    %145 = arith.select %143, %136, %144 : vector<32x3xi1>, vector<32x3xf32>
    %146 = arith.addf %134, %145 : vector<32x3xf32>
    %147 = vector.extract_strided_slice %107 {offsets = [0, 9], sizes = [32, 3], strides = [1, 1]} : vector<32x45xf32> to vector<32x3xf32>
    %c4_i32 = arith.constant 4 : i32
    %148 = tpu.dynamic_rotate %147 by %c4_i32 dim 0 : vector<32x3xf32>, i32 -> vector<32x3xf32>
    %c4_i32_36 = arith.constant 4 : i32
    %149 = vector.broadcast %c4_i32_36 : i32 to vector<32x1xi32>
    %150 = arith.cmpi sge, %16, %149 : vector<32x1xi32>
    %c20_i32 = arith.constant 20 : i32
    %151 = vector.broadcast %c20_i32 : i32 to vector<32x1xi32>
    %152 = arith.cmpi slt, %16, %151 : vector<32x1xi32>
    %153 = arith.andi %150, %152 : vector<32x1xi1>
    %cst_37 = arith.constant 0.000000e+00 : f32
    %154 = vector.shape_cast %153 : vector<32x1xi1> to vector<32x1xi1>
    %155 = vector.broadcast %154 : vector<32x1xi1> to vector<32x3xi1>
    %156 = vector.broadcast %cst_37 : f32 to vector<32x3xf32>
    %157 = arith.select %155, %148, %156 : vector<32x3xi1>, vector<32x3xf32>
    %158 = arith.addf %146, %157 : vector<32x3xf32>
    %159 = vector.extract_strided_slice %107 {offsets = [0, 12], sizes = [32, 3], strides = [1, 1]} : vector<32x45xf32> to vector<32x3xf32>
    %c3_i32_38 = arith.constant 3 : i32
    %160 = tpu.dynamic_rotate %159 by %c3_i32_38 dim 0 : vector<32x3xf32>, i32 -> vector<32x3xf32>
    %c3_i32_39 = arith.constant 3 : i32
    %161 = vector.broadcast %c3_i32_39 : i32 to vector<32x1xi32>
    %162 = arith.cmpi sge, %16, %161 : vector<32x1xi32>
    %c19_i32_40 = arith.constant 19 : i32
    %163 = vector.broadcast %c19_i32_40 : i32 to vector<32x1xi32>
    %164 = arith.cmpi slt, %16, %163 : vector<32x1xi32>
    %165 = arith.andi %162, %164 : vector<32x1xi1>
    %cst_41 = arith.constant 0.000000e+00 : f32
    %166 = vector.shape_cast %165 : vector<32x1xi1> to vector<32x1xi1>
    %167 = vector.broadcast %166 : vector<32x1xi1> to vector<32x3xi1>
    %168 = vector.broadcast %cst_41 : f32 to vector<32x3xf32>
    %169 = arith.select %167, %160, %168 : vector<32x3xi1>, vector<32x3xf32>
    %170 = arith.addf %158, %169 : vector<32x3xf32>
    %171 = vector.extract_strided_slice %107 {offsets = [0, 15], sizes = [32, 3], strides = [1, 1]} : vector<32x45xf32> to vector<32x3xf32>
    %c2_i32_42 = arith.constant 2 : i32
    %172 = tpu.dynamic_rotate %171 by %c2_i32_42 dim 0 : vector<32x3xf32>, i32 -> vector<32x3xf32>
    %c2_i32_43 = arith.constant 2 : i32
    %173 = vector.broadcast %c2_i32_43 : i32 to vector<32x1xi32>
    %174 = arith.cmpi sge, %16, %173 : vector<32x1xi32>
    %c18_i32_44 = arith.constant 18 : i32
    %175 = vector.broadcast %c18_i32_44 : i32 to vector<32x1xi32>
    %176 = arith.cmpi slt, %16, %175 : vector<32x1xi32>
    %177 = arith.andi %174, %176 : vector<32x1xi1>
    %cst_45 = arith.constant 0.000000e+00 : f32
    %178 = vector.shape_cast %177 : vector<32x1xi1> to vector<32x1xi1>
    %179 = vector.broadcast %178 : vector<32x1xi1> to vector<32x3xi1>
    %180 = vector.broadcast %cst_45 : f32 to vector<32x3xf32>
    %181 = arith.select %179, %172, %180 : vector<32x3xi1>, vector<32x3xf32>
    %182 = arith.addf %170, %181 : vector<32x3xf32>
    %183 = vector.extract_strided_slice %107 {offsets = [0, 18], sizes = [32, 3], strides = [1, 1]} : vector<32x45xf32> to vector<32x3xf32>
    %c1_i32_46 = arith.constant 1 : i32
    %184 = tpu.dynamic_rotate %183 by %c1_i32_46 dim 0 : vector<32x3xf32>, i32 -> vector<32x3xf32>
    %c1_i32_47 = arith.constant 1 : i32
    %185 = vector.broadcast %c1_i32_47 : i32 to vector<32x1xi32>
    %186 = arith.cmpi sge, %16, %185 : vector<32x1xi32>
    %c17_i32_48 = arith.constant 17 : i32
    %187 = vector.broadcast %c17_i32_48 : i32 to vector<32x1xi32>
    %188 = arith.cmpi slt, %16, %187 : vector<32x1xi32>
    %189 = arith.andi %186, %188 : vector<32x1xi1>
    %cst_49 = arith.constant 0.000000e+00 : f32
    %190 = vector.shape_cast %189 : vector<32x1xi1> to vector<32x1xi1>
    %191 = vector.broadcast %190 : vector<32x1xi1> to vector<32x3xi1>
    %192 = vector.broadcast %cst_49 : f32 to vector<32x3xf32>
    %193 = arith.select %191, %184, %192 : vector<32x3xi1>, vector<32x3xf32>
    %194 = arith.addf %182, %193 : vector<32x3xf32>
    %195 = vector.extract_strided_slice %107 {offsets = [0, 21], sizes = [32, 3], strides = [1, 1]} : vector<32x45xf32> to vector<32x3xf32>
    %196 = arith.addf %194, %195 : vector<32x3xf32>
    %197 = vector.extract_strided_slice %107 {offsets = [0, 24], sizes = [32, 3], strides = [1, 1]} : vector<32x45xf32> to vector<32x3xf32>
    %c31_i32_50 = arith.constant 31 : i32
    %198 = tpu.dynamic_rotate %197 by %c31_i32_50 dim 0 : vector<32x3xf32>, i32 -> vector<32x3xf32>
    %c-1_i32_51 = arith.constant -1 : i32
    %199 = vector.broadcast %c-1_i32_51 : i32 to vector<32x1xi32>
    %200 = arith.cmpi sge, %16, %199 : vector<32x1xi32>
    %c15_i32_52 = arith.constant 15 : i32
    %201 = vector.broadcast %c15_i32_52 : i32 to vector<32x1xi32>
    %202 = arith.cmpi slt, %16, %201 : vector<32x1xi32>
    %203 = arith.andi %200, %202 : vector<32x1xi1>
    %cst_53 = arith.constant 0.000000e+00 : f32
    %204 = vector.shape_cast %203 : vector<32x1xi1> to vector<32x1xi1>
    %205 = vector.broadcast %204 : vector<32x1xi1> to vector<32x3xi1>
    %206 = vector.broadcast %cst_53 : f32 to vector<32x3xf32>
    %207 = arith.select %205, %198, %206 : vector<32x3xi1>, vector<32x3xf32>
    %208 = arith.addf %196, %207 : vector<32x3xf32>
    %209 = vector.extract_strided_slice %107 {offsets = [0, 27], sizes = [32, 3], strides = [1, 1]} : vector<32x45xf32> to vector<32x3xf32>
    %c30_i32_54 = arith.constant 30 : i32
    %210 = tpu.dynamic_rotate %209 by %c30_i32_54 dim 0 : vector<32x3xf32>, i32 -> vector<32x3xf32>
    %c-2_i32_55 = arith.constant -2 : i32
    %211 = vector.broadcast %c-2_i32_55 : i32 to vector<32x1xi32>
    %212 = arith.cmpi sge, %16, %211 : vector<32x1xi32>
    %c14_i32_56 = arith.constant 14 : i32
    %213 = vector.broadcast %c14_i32_56 : i32 to vector<32x1xi32>
    %214 = arith.cmpi slt, %16, %213 : vector<32x1xi32>
    %215 = arith.andi %212, %214 : vector<32x1xi1>
    %cst_57 = arith.constant 0.000000e+00 : f32
    %216 = vector.shape_cast %215 : vector<32x1xi1> to vector<32x1xi1>
    %217 = vector.broadcast %216 : vector<32x1xi1> to vector<32x3xi1>
    %218 = vector.broadcast %cst_57 : f32 to vector<32x3xf32>
    %219 = arith.select %217, %210, %218 : vector<32x3xi1>, vector<32x3xf32>
    %220 = arith.addf %208, %219 : vector<32x3xf32>
    %221 = vector.extract_strided_slice %107 {offsets = [0, 30], sizes = [32, 3], strides = [1, 1]} : vector<32x45xf32> to vector<32x3xf32>
    %c29_i32_58 = arith.constant 29 : i32
    %222 = tpu.dynamic_rotate %221 by %c29_i32_58 dim 0 : vector<32x3xf32>, i32 -> vector<32x3xf32>
    %c-3_i32_59 = arith.constant -3 : i32
    %223 = vector.broadcast %c-3_i32_59 : i32 to vector<32x1xi32>
    %224 = arith.cmpi sge, %16, %223 : vector<32x1xi32>
    %c13_i32_60 = arith.constant 13 : i32
    %225 = vector.broadcast %c13_i32_60 : i32 to vector<32x1xi32>
    %226 = arith.cmpi slt, %16, %225 : vector<32x1xi32>
    %227 = arith.andi %224, %226 : vector<32x1xi1>
    %cst_61 = arith.constant 0.000000e+00 : f32
    %228 = vector.shape_cast %227 : vector<32x1xi1> to vector<32x1xi1>
    %229 = vector.broadcast %228 : vector<32x1xi1> to vector<32x3xi1>
    %230 = vector.broadcast %cst_61 : f32 to vector<32x3xf32>
    %231 = arith.select %229, %222, %230 : vector<32x3xi1>, vector<32x3xf32>
    %232 = arith.addf %220, %231 : vector<32x3xf32>
    %233 = vector.extract_strided_slice %107 {offsets = [0, 33], sizes = [32, 3], strides = [1, 1]} : vector<32x45xf32> to vector<32x3xf32>
    %c28_i32 = arith.constant 28 : i32
    %234 = tpu.dynamic_rotate %233 by %c28_i32 dim 0 : vector<32x3xf32>, i32 -> vector<32x3xf32>
    %c-4_i32 = arith.constant -4 : i32
    %235 = vector.broadcast %c-4_i32 : i32 to vector<32x1xi32>
    %236 = arith.cmpi sge, %16, %235 : vector<32x1xi32>
    %c12_i32 = arith.constant 12 : i32
    %237 = vector.broadcast %c12_i32 : i32 to vector<32x1xi32>
    %238 = arith.cmpi slt, %16, %237 : vector<32x1xi32>
    %239 = arith.andi %236, %238 : vector<32x1xi1>
    %cst_62 = arith.constant 0.000000e+00 : f32
    %240 = vector.shape_cast %239 : vector<32x1xi1> to vector<32x1xi1>
    %241 = vector.broadcast %240 : vector<32x1xi1> to vector<32x3xi1>
    %242 = vector.broadcast %cst_62 : f32 to vector<32x3xf32>
    %243 = arith.select %241, %234, %242 : vector<32x3xi1>, vector<32x3xf32>
    %244 = arith.addf %232, %243 : vector<32x3xf32>
    %245 = vector.extract_strided_slice %107 {offsets = [0, 36], sizes = [32, 3], strides = [1, 1]} : vector<32x45xf32> to vector<32x3xf32>
    %c27_i32 = arith.constant 27 : i32
    %246 = tpu.dynamic_rotate %245 by %c27_i32 dim 0 : vector<32x3xf32>, i32 -> vector<32x3xf32>
    %c-5_i32 = arith.constant -5 : i32
    %247 = vector.broadcast %c-5_i32 : i32 to vector<32x1xi32>
    %248 = arith.cmpi sge, %16, %247 : vector<32x1xi32>
    %c11_i32 = arith.constant 11 : i32
    %249 = vector.broadcast %c11_i32 : i32 to vector<32x1xi32>
    %250 = arith.cmpi slt, %16, %249 : vector<32x1xi32>
    %251 = arith.andi %248, %250 : vector<32x1xi1>
    %cst_63 = arith.constant 0.000000e+00 : f32
    %252 = vector.shape_cast %251 : vector<32x1xi1> to vector<32x1xi1>
    %253 = vector.broadcast %252 : vector<32x1xi1> to vector<32x3xi1>
    %254 = vector.broadcast %cst_63 : f32 to vector<32x3xf32>
    %255 = arith.select %253, %246, %254 : vector<32x3xi1>, vector<32x3xf32>
    %256 = arith.addf %244, %255 : vector<32x3xf32>
    %257 = vector.extract_strided_slice %107 {offsets = [0, 39], sizes = [32, 3], strides = [1, 1]} : vector<32x45xf32> to vector<32x3xf32>
    %c26_i32 = arith.constant 26 : i32
    %258 = tpu.dynamic_rotate %257 by %c26_i32 dim 0 : vector<32x3xf32>, i32 -> vector<32x3xf32>
    %c-6_i32 = arith.constant -6 : i32
    %259 = vector.broadcast %c-6_i32 : i32 to vector<32x1xi32>
    %260 = arith.cmpi sge, %16, %259 : vector<32x1xi32>
    %c10_i32 = arith.constant 10 : i32
    %261 = vector.broadcast %c10_i32 : i32 to vector<32x1xi32>
    %262 = arith.cmpi slt, %16, %261 : vector<32x1xi32>
    %263 = arith.andi %260, %262 : vector<32x1xi1>
    %cst_64 = arith.constant 0.000000e+00 : f32
    %264 = vector.shape_cast %263 : vector<32x1xi1> to vector<32x1xi1>
    %265 = vector.broadcast %264 : vector<32x1xi1> to vector<32x3xi1>
    %266 = vector.broadcast %cst_64 : f32 to vector<32x3xf32>
    %267 = arith.select %265, %258, %266 : vector<32x3xi1>, vector<32x3xf32>
    %268 = arith.addf %256, %267 : vector<32x3xf32>
    %269 = vector.extract_strided_slice %107 {offsets = [0, 42], sizes = [32, 3], strides = [1, 1]} : vector<32x45xf32> to vector<32x3xf32>
    %c25_i32 = arith.constant 25 : i32
    %270 = tpu.dynamic_rotate %269 by %c25_i32 dim 0 : vector<32x3xf32>, i32 -> vector<32x3xf32>
    %c-7_i32 = arith.constant -7 : i32
    %271 = vector.broadcast %c-7_i32 : i32 to vector<32x1xi32>
    %272 = arith.cmpi sge, %16, %271 : vector<32x1xi32>
    %c9_i32 = arith.constant 9 : i32
    %273 = vector.broadcast %c9_i32 : i32 to vector<32x1xi32>
    %274 = arith.cmpi slt, %16, %273 : vector<32x1xi32>
    %275 = arith.andi %272, %274 : vector<32x1xi1>
    %cst_65 = arith.constant 0.000000e+00 : f32
    %276 = vector.shape_cast %275 : vector<32x1xi1> to vector<32x1xi1>
    %277 = vector.broadcast %276 : vector<32x1xi1> to vector<32x3xi1>
    %278 = vector.broadcast %cst_65 : f32 to vector<32x3xf32>
    %279 = arith.select %277, %270, %278 : vector<32x3xi1>, vector<32x3xf32>
    %280 = arith.addf %268, %279 : vector<32x3xf32>
    %cst_66 = arith.constant dense<0xFF800000> : vector<32xf32>
    %281 = vector.multi_reduction <maximumf>, %280, %cst_66 [1] : vector<32x3xf32> to vector<32xf32>
    %282 = vector.shape_cast %281 : vector<32xf32> to vector<32x1xf32>
    %283 = vector.broadcast %282 : vector<32x1xf32> to vector<32x3xf32>
    %284 = arith.subf %280, %283 : vector<32x3xf32>
    %285 = math.exp %284 : vector<32x3xf32>
    %cst_67 = arith.constant dense<0.000000e+00> : vector<32xf32>
    %286 = vector.multi_reduction <add>, %285, %cst_67 [1] : vector<32x3xf32> to vector<32xf32>
    %287 = vector.shape_cast %286 : vector<32xf32> to vector<32x1xf32>
    %288 = math.log %287 : vector<32x1xf32>
    %289 = vector.broadcast %288 : vector<32x1xf32> to vector<32x3xf32>
    %290 = arith.subf %284, %289 : vector<32x3xf32>
    %c0_68 = arith.constant 0 : index
    %c0_69 = arith.constant 0 : index
    %291 = vector.load %arg8[%c0_68, %c0_69] : memref<32x3xf32, #tpu.memory_space<vmem>>, vector<32x3xf32>
    tpu.vector_store %arg8[%c0_68, %c0_69], %290 {strides = array<i32>} : memref<32x3xf32, #tpu.memory_space<vmem>>, vector<32x3xf32>,
    return
  }
  func.func @transform_0(%arg0: i32) -> (i32, i32) {
    %c0_i32 = arith.constant 0 : i32
    %c0_i32_0 = arith.constant 0 : i32
    return %arg0, %c0_i32 : i32, i32
  }
  func.func @transform_1(%arg0: i32) -> (i32, i32) {
    %c0_i32 = arith.constant 0 : i32
    %c0_i32_0 = arith.constant 0 : i32
    %c0_i32_1 = arith.constant 0 : i32
    return %c0_i32, %c0_i32_0 : i32, i32
  }
  func.func @transform_2(%arg0: i32) -> (i32, i32) {
    %c0_i32 = arith.constant 0 : i32
    %c0_i32_0 = arith.constant 0 : i32
    %c0_i32_1 = arith.constant 0 : i32
    return %c0_i32, %c0_i32_0 : i32, i32
  }
  func.func @transform_3(%arg0: i32) -> (i32, i32) {
    %c0_i32 = arith.constant 0 : i32
    %c0_i32_0 = arith.constant 0 : i32
    %c0_i32_1 = arith.constant 0 : i32
    return %c0_i32, %c0_i32_0 : i32, i32
  }
  func.func @transform_4(%arg0: i32) -> (i32, i32) {
    %c0_i32 = arith.constant 0 : i32
    %c0_i32_0 = arith.constant 0 : i32
    %c0_i32_1 = arith.constant 0 : i32
    return %c0_i32, %c0_i32_0 : i32, i32
  }
  func.func @transform_5(%arg0: i32) -> (i32, i32) {
    %c0_i32 = arith.constant 0 : i32
    %c0_i32_0 = arith.constant 0 : i32
    %c0_i32_1 = arith.constant 0 : i32
    return %c0_i32, %c0_i32_0 : i32, i32
  }
  func.func @transform_6(%arg0: i32) -> (i32, i32) {
    %c0_i32 = arith.constant 0 : i32
    %c0_i32_0 = arith.constant 0 : i32
    %c0_i32_1 = arith.constant 0 : i32
    return %c0_i32, %c0_i32_0 : i32, i32
  }
  func.func @transform_7(%arg0: i32) -> (i32, i32) {
    %c0_i32 = arith.constant 0 : i32
    %c0_i32_0 = arith.constant 0 : i32
    return %arg0, %c0_i32 : i32, i32
  }
}

</mosaic_0001>

<bundles_post_ra>
// kernel: convnet_forward.1
= control target key start
LH: loop header
LB: loop body
LE: loop exit
PB: predicated region body
PF: predicated region fallthrough
CT: control target
= control target key end

     0   :  { %vm104_vm0 = vcmask 1041408   ;;  %vm91_vm1 = vcmask 15360   ;;  %vm204_vm2 = vcmask 408576   ;;  %v26_v28 = vlaneseq  ;;  %s1481_s25 = smov 95   ;;  %s1482_s26 = smov 84   ;;  %s2256_s1 = inlined_call_operand.vmem [shape: f32[2,50], index: 1, kind: input, shape index: {}]   ;;  %s2257_s0 = inlined_call_operand.vmem [shape: f32[32,2], index: 0, kind: input, shape index: {}]   ;;  %s2258_s3 = inlined_call_operand.vmem [shape: f32[50,77], index: 3, kind: input, shape index: {}]   ;;  %s2259_s2 = inlined_call_operand.vmem [shape: f32[1,50], index: 2, kind: input, shape index: {}]   ;;  %s2260_s5 = inlined_call_operand.vmem [shape: f32[11,45], index: 5, kind: input, shape index: {}]   ;;  %s2261_s4 = inlined_call_operand.vmem [shape: f32[1,11], index: 4, kind: input, shape index: {}]   ;;  %s2262_s6 = inlined_call_operand.vmem [shape: f32[1,3], index: 6, kind: input, shape index: {}]   ;;  %s2263_s7 = inlined_call_operand.vmem [shape: f32[32,3], index: 7, kind: output, shape index: {}]  }
   0x1   :  { %v83_v0 = vld [vmem:[%s2256_s1] sm:$0x3]  ;;  %v80_v2 = vld [vmem:[%s2257_s0 + $0x8] sm:$0xff]  ;;  %v81_v3 = vld [vmem:[%s2257_s0 + $0x10] sm:$0xff]  ;;  %s1483_s27 = smov 73   ;;  %s1484_s28 = smov 62  }
   0x2   :  { %v79_v1 = vld [vmem:[%s2257_s0] sm:$0xff]  ;;  %1387 = vmatprep.subr.msk.mxu0 %vm104_vm0, %v83_v0  ;;  %v198_v5 = vld [vmem:[%s2258_s3 + $0x8] sm:$0xff]  ;;  %v199_v6 = vld [vmem:[%s2258_s3 + $0x10] sm:$0xff]  ;;  %v1586_v29 = vshrl.u32 %v26_v28, 7  ;;  %vm633_vm4 = vcmask 1042432   ;;  %vm1485_vm5 = vmmov 1  }
   0x3   :  { %1389 = vmatprep.mubr.msk.f32.mxu0 %vm91_vm1, %v79_v1  ;;  %v197_v4 = vld [vmem:[%s2258_s3] sm:$0xff]  ;;  %1388 = vmatpush3.msk.msra.mxu0 %vm104_vm0, %v83_v0  ;;  %v200_v7 = vld [vmem:[%s2258_s3 + $0x18] sm:$0xff]  ;;  %v202_v12 = vld [vmem:[%s2258_s3 + $0x28] sm:$0xff]  ;;  %s1487_s1 = smov 122   ;;  %s1488_s11 = smov 119  }
   0x4   :  { %1390 = vmatmul.mubr.msk.f32.vlgmr.msra.gmra.mrb[0].mxu0 %vm91_vm1, %v80_v2  ;;  %v1425_v8 = vpack.c.bf16 %v198_v5, %v197_v4  ;;  %v1429_v9 = vpack.c.bf16 %v200_v7, %v199_v6  ;;  %v82_v10 = vld [vmem:[%s2257_s0 + $0x18] sm:$0xff]  ;;  %v201_v11 = vld [vmem:[%s2258_s3 + $0x20] sm:$0xff]  ;;  %v203_v14 = vld [vmem:[%s2258_s3 + $0x30] sm:$0x3]  ;;  %s1480_s3 = smov 117   ;;  %vm316_vm3 = vcmp.lt.s32.totalorder %v1586_v29, 3 }
   0x5   :  { %1392 = vmatprep.mubr.msk.f32.mxu0 %vm91_vm1, %v81_v3  ;;  %v1433_v13 = vpack.c.bf16 %v202_v12, %v201_v11  ;;  %v1347_v15 = vld [vmem:[%s2259_s2] ss:$0 sm:$0xff]  ;;  %s1479_s2 = smov 106   ;;  %v619_v43 = vld [vmem:[%s2260_s5 + $0x8] sm:$0x7]  ;;  %vm1438_vm6 = vmpackc.low %vm633_vm4, %vm1485_vm5  ;;  %v29_v53 = vadd.s32 16, %v1586_v29 }
   0x6   :  { %1426 = vmatprep.subr.bf16.mxu1 %v1425_v8  ;;  %v618_v42 = vld [vmem:[%s2260_s5] sm:$0xff]  ;;  %v1639_v56 = vand.u32 15, %v1586_v29  ;;  %v28_v62 = vadd.s32 8, %v1586_v29  ;;  %vm369_vm9 = vcmp.lt.s32.totalorder %v1586_v29, 2  ;;  %vm418_vm11 = vcmp.lt.s32.totalorder %v1586_v29, 1  ;;  %s1489_s12 = smov 116  }
   0x7   :  { %1428 = vmatpush3.bf16.msra.mxu1 %v1425_v8  ;;  %v1437_v44 = vpack.c.bf16 %v619_v43, %v618_v42  ;;  %v1641_v57 = vand.u32 15, %v29_v53  ;;  %v1358_v60 = vld [vmem:[%s2261_s4] ss:$0 sm:$0xff]  ;;  %v30_v6 = vadd.s32 24, %v1586_v29  ;;  %vm532_vm12 = vcmp.lt.s32.totalorder %v1586_v29, 6  ;;  %s1486_s4 = smov 125  }
   0x8   :  { %1393 = vmatmul.mubr.msk.f32.gmra.mrb[2].mxu0 %vm91_vm1, %v82_v10  ;;  %1430 = vmatprep.subr.bf16.mxu1 %v1429_v9  ;;  %vm321_vm7 = vcmp.ge.s32.totalorder %v1639_v56, 3  ;;  %vm374_vm10 = vcmp.ge.s32.totalorder %v1639_v56, 2  ;;  %vm483_vm13 = vcmp.lt.s32.totalorder %v1586_v29, 7  ;;  %vm581_vm14 = vcmp.lt.s32.totalorder %v1586_v29, 5  ;;  %s1490_s13 = smov 113   ;;  %s1491_s14 = smov 110  }
   0x9   :  { %1439 = vmatprep.subr.msk.bf16.mxu0 %vm1438_vm6, %v1437_v44  ;;  %vm323_vm8 = vcmp.ge.s32.totalorder %v1641_v57, 3  ;;  %vm423_vm15 = vcmp.ge.s32.totalorder %v1639_v56, 1  ;;  %vm2264_vm1 = vcmp.ge.s32.totalorder %v1641_v57, 1  ;;  %s1492_s15 = smov 104   ;;  %s1493_s16 = smov 107  }
   0xa   :  { %1442 = vmatpush3.bf16.msk.msra.mxu0 %vm1438_vm6, %v1437_v44  ;;  %s1494_s17 = smov 101   ;;  %s1495_s18 = smov 98  }
   0xb   :  { %1432 = vmatpush3.bf16.msra.mxu1 %v1429_v9  ;;  %v1670_v9 = vand.u32 15, %v28_v62  ;;  %s1496_s19 = smov 92   ;;  %s1497_s20 = smov 89  }
   0xc   :  { %1434 = vmatprep.subr.bf16.mxu1 %v1433_v13  ;;  %s1498_s21 = smov 86  }
   0xd   :  { %vm2266_vm4 = vcmp.lt.s32.totalorder %v1670_v9, 14  ;;  %vm2268_vm6 = vcmp.lt.s32.totalorder %v1670_v9, 13 }
   0xf   :  { %1436 = vmatpush3.bf16.msra.mxu1 %v1433_v13 }
  0x10   :  { %1407 = vmatprep.subr.msk.mxu1 %vm104_vm0, %v203_v14 }
  0x13   :  { %1408 = vmatpush3.msk.msra.mxu1 %vm104_vm0, %v203_v14  ;;  %vm376_vm0 = vcmp.ge.s32.totalorder %v1641_v57, 2 }
  0xd7   :  { %v1391_v16 = vpop.f32.mrb[0].mxu0 }
  0xd8   :  { %v180_v17 = vadd.f32 %v1391_v16, %v1347_v15  ;;  %v174_v18 = vpop.f32.mrb[1].mxu0 }
  0xd9   :  { %v175_v19 = vadd.f32 %v1347_v15, %v174_v18 }
  0xda   :  { %v194_v22 = vmax.f32 %v180_v17, 0.0 }
  0xdb   :  { %v193_v20 = vmax.f32 %v175_v19, 0.0  ;;  %v1394_v21 = vpop.f32.mrb[2].mxu0 }
  0xdc   :  { %v190_v23 = vadd.f32 %v1394_v21, %v1347_v15  ;;  %v184_v24 = vpop.f32.mrb[3].mxu0 }
  0xdd   :  { %v185_v25 = vadd.f32 %v1347_v15, %v184_v24  ;;  %1409 = vmatprep.mubr.msk.f32.mxu1 %vm204_vm2, %v193_v20  ;;  %v1677_v20 = vand.u32 15, %v30_v6 }
  0xde   :  { %v196_v26 = vmax.f32 %v190_v23, 0.0  ;;  %1410 = vmatmul.mubr.msk.f32.vlgmr.msra.gmra.mrb[0].mxu1 %vm204_vm2, %v194_v22 }
  0xdf   :  { %v195_v27 = vmax.f32 %v185_v25, 0.0  ;;  %vm2270_vm5 = vcmp.lt.s32.totalorder %v1677_v20, 15 }
  0xe1   :  { %1412 = vmatprep.mubr.msk.f32.mxu1 %vm204_vm2, %v195_v27 }
  0xe2   :  { %1413 = vmatmul.mubr.msk.f32.gmra.mrb[2].mxu1 %vm204_vm2, %v196_v26  ;;  %vm2265_vm2 = vcmp.lt.s32.totalorder %v1670_v9, 15 }
 0x1b1   :  { %v1411_v30 = vpop.f32.mrb[0].mxu1 }
 0x1b2   :  { %404 = vrot.lane.b32.xlu0 %v1411_v30, %s1479_s2  ;;  %355 = vrot.lane.b32.xlu1 %v1411_v30, %s1480_s3  ;;  %v286_v31 = vpop.f32.mrb[1].mxu1  ;;  %v313_v32 = vrot.slane %v1411_v30, 5 }
 0x1b3   :  { %v312_v33 = vrot.slane %v286_v31, 5 }
 0x1b5   :  { %v1414_v34 = vpop.f32.mrb[2].mxu1  ;;  %v1593_v35 = vsel %vm316_vm3, %v312_v33, %v313_v32 }
 0x1b6   :  { %453 = vrot.lane.b32.xlu0 %v1411_v30, %s1481_s25  ;;  %469 = vrot.lane.b32.xlu1 %v1411_v30, %s1482_s26  ;;  %v296_v36 = vpop.f32.mrb[3].mxu1  ;;  %v315_v37 = vrot.slane %v1414_v34, 5  ;;  %v346_v5 = vadd.f32 %v1358_v60, %v1593_v35 }
 0x1b7   :  { %v314_v38 = vrot.slane %v296_v36, 5 }
 0x1b8   :  { %v320_v39 = vsel %vm316_vm3, %v315_v37, %v312_v33 }
 0x1b9   :  { %v1601_v40 = vsel %vm316_vm3, %v314_v38, %v315_v37  ;;  %v318_v41 = vsel %vm316_vm3, %v313_v32, %v314_v38  ;;  %v341_v1 = vsel %vm321_vm7, %v320_v39, 0.0 }
 0x1ba   :  { %518 = vrot.lane.b32.xlu0 %v1411_v30, %s1483_s27  ;;  %402 = vrot.lane.b32.xlu1 %v286_v31, %s1479_s2  ;;  %v343_v4 = vsel %vm323_vm8, %v318_v41, 0.0  ;;  %v345_v10 = vadd.f32 %v1358_v60, %v341_v1  ;;  %v348_v14 = vadd.f32 %v1358_v60, %v1601_v40 }
 0x1bb   :  { %v347_v15 = vadd.f32 %v1358_v60, %v343_v4 }
 0x1be   :  { %567 = vrot.lane.b32.xlu0 %v1411_v30, %s1484_s28  ;;  %451 = vrot.lane.b32.xlu1 %v286_v31, %s1481_s25 }
 0x1c2   :  { %516 = vrot.lane.b32.xlu1 %v286_v31, %s1483_s27  ;;  %353 = vrot.lane.b32.xlu0 %v286_v31, %s1480_s3 }
 0x1c6   :  { %565 = vrot.lane.b32.xlu1 %v286_v31, %s1484_s28  ;;  %467 = vrot.lane.b32.xlu0 %v286_v31, %s1482_s26 }
 0x1ca   :  { %457 = vrot.lane.b32.xlu1 %v1414_v34, %s1481_s25  ;;  %359 = vrot.lane.b32.xlu0 %v1414_v34, %s1480_s3 }
 0x1ce   :  { %408 = vrot.lane.b32.xlu0 %v1414_v34, %s1479_s2  ;;  %357 = vrot.lane.b32.xlu1 %v296_v36, %s1480_s3 }
 0x1d2   :  { %473 = vrot.lane.b32.xlu0 %v1414_v34, %s1482_s26  ;;  %406 = vrot.lane.b32.xlu1 %v296_v36, %s1479_s2 }
 0x1d6   :  { %471 = vrot.lane.b32.xlu0 %v296_v36, %s1482_s26  ;;  %520 = vrot.lane.b32.xlu1 %v296_v36, %s1483_s27 }
 0x1da   :  { %455 = vrot.lane.b32.xlu0 %v296_v36, %s1481_s25  ;;  %569 = vrot.lane.b32.xlu1 %v296_v36, %s1484_s28 }
 0x1de   :  { %522 = vrot.lane.b32.xlu0 %v1414_v34, %s1483_s27  ;;  %571 = vrot.lane.b32.xlu1 %v1414_v34, %s1484_s28 }
 0x224   :  { %v1623_v45 = vpop.permute.xlu0 %404  ;;  %v356_v46 = vpop.permute.xlu1 %355 }
 0x225   :  { %v366_v2 = vrot.slane %v356_v46, 6  ;;  %v415_v21 = vrot.slane %v1623_v45, 7 }
 0x228   :  { %v1625_v47 = vpop.permute.xlu0 %453  ;;  %v1627_v48 = vpop.permute.xlu1 %469 }
 0x229   :  { %v480_v34 = vrot.slane %v1627_v48, 1 }
 0x22c   :  { %v1629_v49 = vpop.permute.xlu0 %518  ;;  %v403_v50 = vpop.permute.xlu1 %402 }
 0x22d   :  { %v414_v16 = vrot.slane %v403_v50, 7  ;;  %v529_v35 = vrot.slane %v1629_v49, 2 }
 0x22f   :  { %v421_v30 = vsel %vm418_vm11, %v414_v16, %v415_v21 }
 0x230   :  { %v1631_v51 = vpop.permute.xlu0 %567  ;;  %v1633_v52 = vpop.permute.xlu1 %451 }
 0x231   :  { %v578_v38 = vrot.slane %v1631_v51, 3 }
 0x234   :  { %v1636_v54 = vpop.permute.xlu1 %516  ;;  %v354_v55 = vpop.permute.xlu0 %353 }
 0x235   :  { %v365_v61 = vrot.slane %v354_v55, 6  ;;  %v528_v36 = vrot.slane %v1636_v54, 2 }
 0x237   :  { %v372_v7 = vsel %vm369_vm9, %v365_v61, %v366_v2  ;;  %v535_v53 = vsel %vm532_vm12, %v528_v36, %v529_v35 }
 0x238   :  { %v1643_v58 = vpop.permute.xlu1 %565  ;;  %v1645_v59 = vpop.permute.xlu0 %467  ;;  %v399_v19 = vadd.f32 %v372_v7, %v346_v5 }
 0x239   :  { %v479_v24 = vrot.slane %v1645_v59, 1  ;;  %v577_v42 = vrot.slane %v1643_v58, 3 }
 0x23a   :  { %v448_v37 = vadd.f32 %v421_v30, %v399_v19 }
 0x23b   :  { %v486_v43 = vsel %vm483_vm13, %v479_v24, %v480_v34 }
 0x23c   :  { %v1654_v63 = vpop.permute.xlu1 %457  ;;  %v360_v0 = vpop.permute.xlu0 %359  ;;  %v464_v55 = vadd.f32 %v1625_v47, %v448_v37 }
 0x23d   :  { %v368_v3 = vrot.slane %v360_v0, 6  ;;  %v584_v0 = vsel %vm581_vm14, %v577_v42, %v578_v38 }
 0x23f   :  { %v373_v8 = vsel %vm369_vm9, %v368_v3, %v365_v61 }
 0x240   :  { %v394_v11 = vsel %vm374_vm10, %v373_v8, 0.0  ;;  %v409_v12 = vpop.permute.xlu0 %408  ;;  %v358_v13 = vpop.permute.xlu1 %357 }
 0x241   :  { %v417_v17 = vrot.slane %v409_v12, 7  ;;  %v367_v18 = vrot.slane %v358_v13, 6  ;;  %v398_v22 = vadd.f32 %v394_v11, %v345_v10 }
 0x243   :  { %v422_v23 = vsel %vm418_vm11, %v417_v17, %v414_v16  ;;  %v371_v26 = vsel %vm369_vm9, %v366_v2, %v367_v18  ;;  %v370_v32 = vsel %vm369_vm9, %v367_v18, %v368_v3 }
 0x244   :  { %v443_v25 = vsel %vm423_vm15, %v422_v23, 0.0  ;;  %v474_v27 = vpop.permute.xlu0 %473  ;;  %v407_v28 = vpop.permute.xlu1 %406  ;;  %v396_v40 = vsel %vm376_vm0, %v371_v26, 0.0  ;;  %v401_v44 = vadd.f32 %v370_v32, %v348_v14 }
 0x245   :  { %v447_v31 = vadd.f32 %v443_v25, %v398_v22  ;;  %v416_v33 = vrot.slane %v407_v28, 7  ;;  %v482_v54 = vrot.slane %v474_v27, 1  ;;  %v400_v58 = vadd.f32 %v396_v40, %v347_v15 }
 0x247   :  { %v463_v39 = vadd.f32 %v1633_v52, %v447_v31  ;;  %v420_v41 = vsel %vm418_vm11, %v415_v21, %v416_v33  ;;  %v419_v45 = vsel %vm418_vm11, %v416_v33, %v417_v17  ;;  %v487_v7 = vsel %vm483_vm13, %v482_v54, %v479_v24 }
 0x248   :  { %v472_v46 = vpop.permute.xlu0 %471  ;;  %v521_v48 = vpop.permute.xlu1 %520  ;;  %v445_v52 = vsel %vm2264_vm1, %v420_v41, 0.0  ;;  %v450_v59 = vadd.f32 %v419_v45, %v401_v44  ;;  %vm620_vm1 = vcmask 89088  }
 0x249   :  { %v512_v49 = vadd.f32 %v486_v43, %v463_v39  ;;  %v481_v50 = vrot.slane %v472_v46, 1  ;;  %v530_v51 = vrot.slane %v521_v48, 2  ;;  %v449_v3 = vadd.f32 %v445_v52, %v400_v58 }
 0x24a   :  { %v466_v11 = vadd.f32 %v1654_v63, %v450_v59  ;;  %v511_v63 = vsel %vm2270_vm5, %v487_v7, 0.0  ;;  %vm791_vm5 = vcmp.ge.s32.totalorder %v1641_v57, 6 }
 0x24b   :  { %v485_v60 = vsel %vm483_vm13, %v480_v34, %v481_v50  ;;  %v534_v61 = vsel %vm532_vm12, %v529_v35, %v530_v51  ;;  %v561_v62 = vadd.f32 %v535_v53, %v512_v49  ;;  %v484_v18 = vsel %vm483_vm13, %v481_v50, %v482_v54  ;;  %v1862_v53 = vld [vmem:[%s2262_s6] ss:$0 sm:$0xff] }
 0x24c   :  { %v509_v1 = vsel %vm2265_vm2, %v485_v60, 0.0  ;;  %v456_v2 = vpop.permute.xlu0 %455  ;;  %v570_v47 = vpop.permute.xlu1 %569  ;;  %v558_v8 = vsel %vm2266_vm4, %v534_v61, 0.0  ;;  %vm2269_vm2 = vcmp.lt.s32.totalorder %v1677_v20, 14  ;;  %vm2267_vm4 = vcmp.lt.s32.totalorder %v1677_v20, 13 }
 0x24d   :  { %v513_v4 = vadd.f32 %v509_v1, %v464_v55  ;;  %v579_v5 = vrot.slane %v570_v47, 3  ;;  %v610_v6 = vadd.f32 %v584_v0, %v561_v62  ;;  %v465_v10 = vadd.f32 %v456_v2, %v449_v3 }
 0x24e   :  { %v515_v25 = vadd.f32 %v511_v63, %v466_v11 }
 0x24f   :  { %v562_v12 = vadd.f32 %v558_v8, %v513_v4  ;;  %v583_v13 = vsel %vm581_vm14, %v578_v38, %v579_v5  ;;  %v614_v14 = vmax.f32 %v610_v6, 0.0  ;;  %v514_v23 = vadd.f32 %v484_v18, %v465_v10 }
 0x250   :  { %v607_v15 = vsel %vm2268_vm6, %v583_v13, 0.0  ;;  %v523_v16 = vpop.permute.xlu0 %522  ;;  %v572_v17 = vpop.permute.xlu1 %571  ;;  %vm739_vm6 = vcmp.ge.s32.totalorder %v1641_v57, 7 }
 0x251   :  { %v611_v19 = vadd.f32 %v607_v15, %v562_v12  ;;  %v531_v21 = vrot.slane %v523_v16, 2  ;;  %v580_v22 = vrot.slane %v572_v17, 3  ;;  %1419 = vmatprep.mubr.msk.f32.mxu0 %vm620_vm1, %v614_v14 }
 0x253   :  { %v615_v24 = vmax.f32 %v611_v19, 0.0  ;;  %v533_v26 = vsel %vm532_vm12, %v530_v51, %v531_v21  ;;  %v536_v27 = vsel %vm532_vm12, %v531_v21, %v528_v36  ;;  %v585_v31 = vsel %vm581_vm14, %v580_v22, %v577_v42 }
 0x254   :  { %v560_v28 = vsel %vm2269_vm2, %v536_v27, 0.0  ;;  %v563_v30 = vadd.f32 %v533_v26, %v514_v23  ;;  %v582_v33 = vsel %vm581_vm14, %v579_v5, %v580_v22  ;;  %v609_v34 = vsel %vm2267_vm4, %v585_v31, 0.0 }
 0x255   :  { %v564_v32 = vadd.f32 %v560_v28, %v515_v25  ;;  %1420 = vmatmul.mubr.msk.f32.vlgmr.msra.gmra.mrb[4].mxu0 %vm620_vm1, %v615_v24  ;;  %vm737_vm4 = vcmp.ge.s32.totalorder %v1639_v56, 7  ;;  %vm789_vm2 = vcmp.ge.s32.totalorder %v1639_v56, 6 }
 0x256   :  { %v612_v35 = vadd.f32 %v582_v33, %v563_v30 }
 0x257   :  { %v613_v37 = vadd.f32 %v609_v34, %v564_v32 }
 0x258   :  { %v616_v38 = vmax.f32 %v612_v35, 0.0 }
 0x259   :  { %v617_v36 = vmax.f32 %v613_v37, 0.0 }
 0x25a   :  { %1422 = vmatprep.mubr.msk.f32.mxu0 %vm620_vm1, %v616_v38 }
 0x25b   :  { %1423 = vmatmul.mubr.msk.f32.gmra.mrb[6].mxu0 %vm620_vm1, %v617_v36  ;;  %vm881_vm1 = vcmp.lt.s32.totalorder %v1586_v29, 4 }
 0x328   :  { %v1421_v39 = vpop.f32.mrb[4].mxu0 }
 0x329   :  { %771 = vrot.lane.b32.xlu1 %v1421_v39, %s1486_s4  ;;  %v703_v40 = vpop.f32.mrb[5].mxu0  ;;  %v730_v41 = vrot.slane %v1421_v39, 1 }
 0x32a   :  { %769 = vrot.lane.b32.xlu0 %v703_v40, %s1486_s4  ;;  %v729_v42 = vrot.slane %v703_v40, 1 }
 0x32c   :  { %v1759_v43 = vsel %vm483_vm13, %v729_v42, %v730_v41 }
 0x32d   :  { %819 = vrot.lane.b32.xlu1 %v1421_v39, %s1487_s1  ;;  %v762_v59 = vadd.f32 %v1862_v53, %v1759_v43 }
 0x32e   :  { %817 = vrot.lane.b32.xlu0 %v703_v40, %s1487_s1  ;;  %v1763_v44 = vpop.f32.mrb[6].mxu0 }
 0x32f   :  { %v1765_v45 = vpop.f32.mrb[7].mxu0  ;;  %v732_v46 = vrot.slane %v1763_v44, 1 }
 0x330   :  { %v731_v48 = vrot.slane %v1765_v45, 1 }
 0x331   :  { %867 = vrot.lane.b32.xlu1 %v1421_v39, %s1488_s11  ;;  %v1772_v49 = vsel %vm483_vm13, %v732_v46, %v729_v42 }
 0x332   :  { %865 = vrot.lane.b32.xlu0 %v703_v40, %s1488_s11  ;;  %v1777_v50 = vsel %vm483_vm13, %v731_v48, %v732_v46  ;;  %v1781_v51 = vsel %vm483_vm13, %v730_v41, %v731_v48 }
 0x335   :  { %916 = vrot.lane.b32.xlu1 %v1421_v39, %s1489_s12 }
 0x336   :  { %914 = vrot.lane.b32.xlu0 %v703_v40, %s1489_s12 }
 0x339   :  { %944 = vrot.lane.b32.xlu1 %v1421_v39, %s1490_s13 }
 0x33a   :  { %942 = vrot.lane.b32.xlu0 %v703_v40, %s1490_s13 }
 0x33d   :  { %972 = vrot.lane.b32.xlu1 %v1421_v39, %s1491_s14 }
 0x33e   :  { %970 = vrot.lane.b32.xlu0 %v703_v40, %s1491_s14 }
 0x341   :  { %1016 = vrot.lane.b32.xlu1 %v1421_v39, %s1492_s15 }
 0x342   :  { %1014 = vrot.lane.b32.xlu0 %v703_v40, %s1492_s15 }
 0x345   :  { %1000 = vrot.lane.b32.xlu1 %v1421_v39, %s1493_s16 }
 0x346   :  { %998 = vrot.lane.b32.xlu0 %v703_v40, %s1493_s16 }
 0x349   :  { %1044 = vrot.lane.b32.xlu1 %v1421_v39, %s1494_s17 }
 0x34a   :  { %1042 = vrot.lane.b32.xlu0 %v703_v40, %s1494_s17 }
 0x34d   :  { %1072 = vrot.lane.b32.xlu1 %v1421_v39, %s1495_s18 }
 0x34e   :  { %1070 = vrot.lane.b32.xlu0 %v703_v40, %s1495_s18 }
 0x351   :  { %1100 = vrot.lane.b32.xlu1 %v1421_v39, %s1481_s25 }
 0x352   :  { %1098 = vrot.lane.b32.xlu0 %v703_v40, %s1481_s25 }
 0x355   :  { %1148 = vrot.lane.b32.xlu1 %v1421_v39, %s1496_s19 }
 0x356   :  { %1146 = vrot.lane.b32.xlu0 %v703_v40, %s1496_s19 }
 0x359   :  { %1196 = vrot.lane.b32.xlu1 %v1421_v39, %s1497_s20 }
 0x35a   :  { %1194 = vrot.lane.b32.xlu0 %v703_v40, %s1497_s20 }
 0x35d   :  { %1244 = vrot.lane.b32.xlu1 %v1421_v39, %s1498_s21 }
 0x35e   :  { %1242 = vrot.lane.b32.xlu0 %v703_v40, %s1498_s21 }
 0x361   :  { %775 = vrot.lane.b32.xlu1 %v1763_v44, %s1486_s4 }
 0x362   :  { %773 = vrot.lane.b32.xlu0 %v1765_v45, %s1486_s4 }
 0x365   :  { %823 = vrot.lane.b32.xlu1 %v1763_v44, %s1487_s1 }
 0x366   :  { %821 = vrot.lane.b32.xlu0 %v1765_v45, %s1487_s1 }
 0x369   :  { %871 = vrot.lane.b32.xlu1 %v1763_v44, %s1488_s11 }
 0x36a   :  { %869 = vrot.lane.b32.xlu0 %v1765_v45, %s1488_s11 }
 0x36d   :  { %920 = vrot.lane.b32.xlu1 %v1763_v44, %s1489_s12 }
 0x36e   :  { %918 = vrot.lane.b32.xlu0 %v1765_v45, %s1489_s12 }
 0x371   :  { %948 = vrot.lane.b32.xlu1 %v1763_v44, %s1490_s13 }
 0x372   :  { %946 = vrot.lane.b32.xlu0 %v1765_v45, %s1490_s13 }
 0x375   :  { %976 = vrot.lane.b32.xlu1 %v1763_v44, %s1491_s14 }
 0x376   :  { %974 = vrot.lane.b32.xlu0 %v1765_v45, %s1491_s14 }
 0x379   :  { %1020 = vrot.lane.b32.xlu1 %v1763_v44, %s1492_s15 }
 0x37a   :  { %1018 = vrot.lane.b32.xlu0 %v1765_v45, %s1492_s15 }
 0x37d   :  { %1004 = vrot.lane.b32.xlu1 %v1763_v44, %s1493_s16 }
 0x37e   :  { %1002 = vrot.lane.b32.xlu0 %v1765_v45, %s1493_s16 }
 0x381   :  { %1048 = vrot.lane.b32.xlu1 %v1763_v44, %s1494_s17 }
 0x382   :  { %1046 = vrot.lane.b32.xlu0 %v1765_v45, %s1494_s17 }
 0x385   :  { %1076 = vrot.lane.b32.xlu1 %v1763_v44, %s1495_s18 }
 0x386   :  { %1074 = vrot.lane.b32.xlu0 %v1765_v45, %s1495_s18 }
 0x389   :  { %1104 = vrot.lane.b32.xlu1 %v1763_v44, %s1481_s25 }
 0x38a   :  { %1102 = vrot.lane.b32.xlu0 %v1765_v45, %s1481_s25 }
 0x38d   :  { %1152 = vrot.lane.b32.xlu1 %v1763_v44, %s1496_s19 }
 0x38e   :  { %1150 = vrot.lane.b32.xlu0 %v1765_v45, %s1496_s19 }
 0x391   :  { %1200 = vrot.lane.b32.xlu1 %v1763_v44, %s1497_s20 }
 0x392   :  { %1198 = vrot.lane.b32.xlu0 %v1765_v45, %s1497_s20 }
 0x395   :  { %1248 = vrot.lane.b32.xlu1 %v1763_v44, %s1498_s21 }
 0x396   :  { %1246 = vrot.lane.b32.xlu0 %v1765_v45, %s1498_s21 }
 0x39b   :  { %v1857_v52 = vpop.permute.xlu1 %771 }
 0x39c   :  { %v782_v54 = vrot.slane %v1857_v52, 2  ;;  %v1865_v55 = vpop.permute.xlu0 %769 }
 0x39d   :  { %v781_v58 = vrot.slane %v1865_v55, 2 }
 0x39f   :  { %v787_v60 = vsel %vm532_vm12, %v781_v58, %v782_v54  ;;  %v1876_v61 = vpop.permute.xlu1 %819 }
 0x3a0   :  { %v814_v62 = vadd.f32 %v787_v60, %v762_v59  ;;  %v830_v0 = vrot.slane %v1876_v61, 3  ;;  %v1879_v1 = vpop.permute.xlu0 %817  ;;  %v757_v59 = vsel %vm737_vm4, %v1772_v49, 0.0  ;;  %vm837_vm4 = vcmp.ge.s32.totalorder %v1639_v56, 5 }
 0x3a1   :  { %v829_v2 = vrot.slane %v1879_v1, 3 }
 0x3a3   :  { %v835_v3 = vsel %vm581_vm14, %v829_v2, %v830_v0  ;;  %v1888_v47 = vpop.permute.xlu1 %867 }
 0x3a4   :  { %v862_v4 = vadd.f32 %v835_v3, %v814_v62  ;;  %v878_v5 = vrot.slane %v1888_v47, 4  ;;  %v1892_v6 = vpop.permute.xlu0 %865  ;;  %v759_v3 = vsel %vm739_vm6, %v1781_v51, 0.0  ;;  %vm839_vm6 = vcmp.ge.s32.totalorder %v1641_v57, 5 }
 0x3a5   :  { %v877_v7 = vrot.slane %v1892_v6, 4 }
 0x3a7   :  { %v884_v8 = vsel %vm881_vm1, %v877_v7, %v878_v5  ;;  %v1901_v10 = vpop.permute.xlu1 %916 }
 0x3a8   :  { %v911_v11 = vadd.f32 %v884_v8, %v862_v4  ;;  %v927_v12 = vrot.slane %v1901_v10, 5  ;;  %v1904_v13 = vpop.permute.xlu0 %914  ;;  %v761_v8 = vadd.f32 %v1862_v53, %v757_v59 }
 0x3a9   :  { %v926_v14 = vrot.slane %v1904_v13, 5 }
 0x3ab   :  { %v932_v15 = vsel %vm316_vm3, %v926_v14, %v927_v12  ;;  %v1913_v16 = vpop.permute.xlu1 %944 }
 0x3ac   :  { %v939_v17 = vadd.f32 %v932_v15, %v911_v11  ;;  %v955_v18 = vrot.slane %v1913_v16, 6  ;;  %v1916_v19 = vpop.permute.xlu0 %942  ;;  %v763_v15 = vadd.f32 %v1862_v53, %v759_v3 }
 0x3ad   :  { %v954_v21 = vrot.slane %v1916_v19, 6 }
 0x3af   :  { %v960_v22 = vsel %vm369_vm9, %v954_v21, %v955_v18  ;;  %v1925_v63 = vpop.permute.xlu1 %972 }
 0x3b0   :  { %v983_v23 = vrot.slane %v1925_v63, 7  ;;  %v1928_v24 = vpop.permute.xlu0 %970  ;;  %v967_v25 = vadd.f32 %v960_v22, %v939_v17 }
 0x3b1   :  { %v982_v26 = vrot.slane %v1928_v24, 7 }
 0x3b3   :  { %v1931_v27 = vpop.permute.xlu1 %1016  ;;  %v988_v28 = vsel %vm418_vm11, %v982_v26, %v983_v23 }
 0x3b4   :  { %v1939_v30 = vpop.permute.xlu0 %1014  ;;  %v995_v31 = vadd.f32 %v988_v28, %v967_v25 }
 0x3b7   :  { %v1001_v32 = vpop.permute.xlu1 %1000 }
 0x3b8   :  { %v1941_v33 = vadd.f32 %v1001_v32, %v995_v31  ;;  %v1943_v34 = vpop.permute.xlu0 %998 }
 0x3bb   :  { %v1945_v35 = vpop.permute.xlu1 %1044 }
 0x3bc   :  { %v1947_v37 = vpop.permute.xlu0 %1042 }
 0x3bf   :  { %v1949_v38 = vpop.permute.xlu1 %1072 }
 0x3c0   :  { %v1951_v36 = vpop.permute.xlu0 %1070 }
 0x3c3   :  { %v1953_v39 = vpop.permute.xlu1 %1100 }
 0x3c4   :  { %v1955_v40 = vpop.permute.xlu0 %1098 }
 0x3c7   :  { %v1957_v41 = vpop.permute.xlu1 %1148 }
 0x3c8   :  { %v1959_v42 = vpop.permute.xlu0 %1146 }
 0x3cb   :  { %v1961_v43 = vpop.permute.xlu1 %1196 }
 0x3cc   :  { %v1963_v44 = vpop.permute.xlu0 %1194 }
 0x3cf   :  { %v1965_v45 = vpop.permute.xlu1 %1244 }
 0x3d0   :  { %v1967_v46 = vpop.permute.xlu0 %1242 }
 0x3d3   :  { %v1971_v48 = vpop.permute.xlu1 %775 }
 0x3d4   :  { %v784_v60 = vrot.slane %v1971_v48, 2  ;;  %v1976_v62 = vpop.permute.xlu0 %773 }
 0x3d5   :  { %v783_v4 = vrot.slane %v1976_v62, 2 }
 0x3d6   :  { %v788_v49 = vsel %vm532_vm12, %v784_v60, %v781_v58 }
 0x3d7   :  { %v809_v11 = vsel %vm789_vm2, %v788_v49, 0.0  ;;  %v786_v51 = vsel %vm532_vm12, %v782_v54, %v783_v4  ;;  %v1993_v17 = vpop.permute.xlu1 %823  ;;  %vm888_vm2 = vcmp.ge.s32.totalorder %v1641_v57, 4 }
 0x3d8   :  { %v813_v22 = vadd.f32 %v809_v11, %v761_v8  ;;  %v811_v25 = vsel %vm791_vm5, %v786_v51, 0.0  ;;  %v832_v55 = vrot.slane %v1993_v17, 3  ;;  %v822_v28 = vpop.permute.xlu0 %821  ;;  %vm886_vm5 = vcmp.ge.s32.totalorder %v1639_v56, 4 }
 0x3d9   :  { %v815_v31 = vadd.f32 %v811_v25, %v763_v15  ;;  %v831_v58 = vrot.slane %v822_v28, 3  ;;  %v1054_v56 = vrot.slane %v1947_v37, 2 }
 0x3da   :  { %v836_v52 = vsel %vm581_vm14, %v832_v55, %v829_v2 }
 0x3db   :  { %v857_v32 = vsel %vm837_vm4, %v836_v52, 0.0  ;;  %v834_v54 = vsel %vm581_vm14, %v830_v0, %v831_v58  ;;  %v872_v59 = vpop.permute.xlu1 %871  ;;  %vm1173_vm4 = vcmp.lt.s32.totalorder %v1677_v20, 11 }
 0x3dc   :  { %v861_v62 = vadd.f32 %v857_v32, %v813_v22  ;;  %v859_v3 = vsel %vm839_vm6, %v834_v54, 0.0  ;;  %v880_v8 = vrot.slane %v872_v59, 4  ;;  %v870_v49 = vpop.permute.xlu0 %869  ;;  %vm2272_vm6 = vcmp.lt.s32.totalorder %v1677_v20, 15 }
 0x3dd   :  { %v863_v11 = vadd.f32 %v859_v3, %v815_v31  ;;  %v879_v15 = vrot.slane %v870_v49, 4 }
 0x3de   :  { %v885_v61 = vsel %vm881_vm1, %v880_v8, %v877_v7 }
 0x3df   :  { %v883_v1 = vsel %vm881_vm1, %v878_v5, %v879_v15  ;;  %v921_v2 = vpop.permute.xlu1 %920  ;;  %v906_v28 = vsel %vm886_vm5, %v885_v61, 0.0  ;;  %v1027_v61 = vrot.slane %v1931_v27, 1  ;;  %vm2273_vm5 = vcmp.lt.s32.totalorder %v1670_v9, 15 }
 0x3e0   :  { %v908_v0 = vsel %vm888_vm2, %v883_v1, 0.0  ;;  %v929_v51 = vrot.slane %v921_v2, 5  ;;  %v919_v17 = vpop.permute.xlu0 %918  ;;  %v910_v59 = vadd.f32 %v906_v28, %v861_v62  ;;  %vm1219_vm2 = vcmp.lt.s32.totalorder %v1670_v9, 10 }
 0x3e1   :  { %v912_v22 = vadd.f32 %v908_v0, %v863_v11  ;;  %v928_v25 = vrot.slane %v919_v17, 5  ;;  %v1026_v0 = vrot.slane %v1939_v30, 1 }
 0x3e2   :  { %v933_v47 = vsel %vm316_vm3, %v929_v51, %v926_v14 }
 0x3e3   :  { %v931_v5 = vsel %vm316_vm3, %v927_v12, %v928_v25  ;;  %v949_v6 = vpop.permute.xlu1 %948  ;;  %v934_v32 = vsel %vm321_vm7, %v933_v47, 0.0  ;;  %vm2271_vm7 = vcmp.ge.s32.totalorder %v1641_v57, 1  ;;  %v1082_v57 = vrot.slane %v1951_v36, 3 }
 0x3e4   :  { %v936_v7 = vsel %vm323_vm8, %v931_v5, 0.0  ;;  %v957_v31 = vrot.slane %v949_v6, 6  ;;  %v947_v52 = vpop.permute.xlu0 %946  ;;  %v938_v49 = vadd.f32 %v934_v32, %v910_v59  ;;  %v882_v5 = vsel %vm881_vm1, %v879_v15, %v880_v8 }
 0x3e5   :  { %v956_v54 = vrot.slane %v947_v52, 6  ;;  %v940_v13 = vadd.f32 %v936_v7, %v912_v22  ;;  %v1110_v52 = vrot.slane %v1955_v40, 4  ;;  %v930_v32 = vsel %vm316_vm3, %v928_v25, %v929_v51 }
 0x3e6   :  { %v961_v10 = vsel %vm369_vm9, %v957_v31, %v954_v21  ;;  %v1159_v15 = vrot.slane %v1957_v41, 5  ;;  %vm1290_vm8 = vcmask 23552  }
 0x3e7   :  { %v962_v12 = vsel %vm374_vm10, %v961_v10, 0.0  ;;  %v959_v14 = vsel %vm369_vm9, %v955_v18, %v956_v54  ;;  %v977_v3 = vpop.permute.xlu1 %976  ;;  %v785_v18 = vsel %vm532_vm12, %v783_v4, %v784_v60  ;;  %v1055_v60 = vrot.slane %v1945_v35, 2 }
 0x3e8   :  { %v985_v11 = vrot.slane %v977_v3, 7  ;;  %v975_v1 = vpop.permute.xlu0 %974  ;;  %v964_v62 = vsel %vm376_vm0, %v959_v14, 0.0  ;;  %v966_v21 = vadd.f32 %v962_v12, %v938_v49  ;;  %v833_v4 = vsel %vm581_vm14, %v831_v58, %v832_v55 }
 0x3e9   :  { %v984_v2 = vrot.slane %v975_v1, 7  ;;  %v968_v19 = vadd.f32 %v964_v62, %v940_v13  ;;  %v1111_v58 = vrot.slane %v1953_v39, 4  ;;  %v1158_v10 = vrot.slane %v1959_v42, 5 }
 0x3ea   :  { %v989_v16 = vsel %vm418_vm11, %v985_v11, %v982_v26  ;;  %v764_v26 = vadd.f32 %v1862_v53, %v1777_v50  ;;  %v1032_v50 = vsel %vm483_vm13, %v1026_v0, %v1027_v61  ;;  %v1083_v53 = vrot.slane %v1949_v38, 3 }
 0x3eb   :  { %v990_v17 = vsel %vm423_vm15, %v989_v16, 0.0  ;;  %v2052_v22 = vpop.permute.xlu1 %1020  ;;  %v987_v24 = vsel %vm418_vm11, %v983_v23, %v984_v2  ;;  %v958_v12 = vsel %vm369_vm9, %v956_v54, %v957_v31  ;;  %v1116_v25 = vsel %vm881_vm1, %v1110_v52, %v1111_v58 }
 0x3ec   :  { %v994_v47 = vadd.f32 %v990_v17, %v966_v21  ;;  %v2060_v30 = vpop.permute.xlu0 %1018  ;;  %v992_v48 = vsel %vm2271_vm7, %v987_v24, 0.0  ;;  %v816_v28 = vadd.f32 %v785_v18, %v764_v26  ;;  %v1088_v8 = vsel %vm581_vm14, %v1082_v57, %v1083_v53 }
 0x3ed   :  { %v996_v63 = vadd.f32 %v992_v48, %v968_v19  ;;  %v1207_v1 = vrot.slane %v1961_v43, 6  ;;  %v986_v62 = vsel %vm418_vm11, %v984_v2, %v985_v11  ;;  %v1206_v19 = vrot.slane %v1963_v44, 6 }
 0x3ee   :  { %v1010_v23 = vadd.f32 %v1943_v34, %v994_v47  ;;  %v864_v6 = vadd.f32 %v833_v4, %v816_v28  ;;  %v1060_v34 = vsel %vm532_vm12, %v1054_v56, %v1055_v60  ;;  %v1029_v31 = vrot.slane %v2052_v22, 1 }
 0x3ef   :  { %v1005_v37 = vpop.permute.xlu1 %1004  ;;  %v1164_v16 = vsel %vm316_vm3, %v1158_v10, %v1159_v15  ;;  %v1028_v18 = vrot.slane %v2060_v30, 1  ;;  %v1255_v24 = vrot.slane %v1965_v45, 7  ;;  %v1254_v11 = vrot.slane %v1967_v46, 7 }
 0x3f0   :  { %v1038_v7 = vadd.f32 %v1032_v50, %v1010_v23  ;;  %v1003_v55 = vpop.permute.xlu0 %1002  ;;  %v913_v13 = vadd.f32 %v882_v5, %v864_v6  ;;  %v1212_v4 = vsel %vm369_vm9, %v1206_v19, %v1207_v1  ;;  %v1033_v30 = vsel %vm483_vm13, %v1029_v31, %v1026_v0 }
 0x3f1   :  { %vm1125_vm10 = vcmp.lt.s32.totalorder %v1677_v20, 12  ;;  %vm1123_vm15 = vcmp.lt.s32.totalorder %v1670_v9, 12  ;;  %v1031_v23 = vsel %vm483_vm13, %v1027_v61, %v1028_v18  ;;  %vm1171_vm0 = vcmp.lt.s32.totalorder %v1670_v9, 11 }
 0x3f2   :  { %v1066_v59 = vadd.f32 %v1060_v34, %v1038_v7  ;;  %v941_v3 = vadd.f32 %v930_v32, %v913_v13  ;;  %v1012_v7 = vadd.f32 %v1003_v55, %v996_v63  ;;  %v1260_v27 = vsel %vm418_vm11, %v1254_v11, %v1255_v24 }
 0x3f3   :  { %v1049_v14 = vpop.permute.xlu1 %1048  ;;  %v1037_v61 = vsel %vm2272_vm6, %v1033_v30, 0.0  ;;  %v1035_v32 = vsel %vm2273_vm5, %v1031_v23, 0.0  ;;  %vm1221_vm7 = vcmp.lt.s32.totalorder %v1677_v20, 10  ;;  %vm2274_vm6 = vcmp.lt.s32.totalorder %v1677_v20, 14 }
 0x3f4   :  { %v1047_v49 = vpop.permute.xlu0 %1046  ;;  %v1094_v51 = vadd.f32 %v1088_v8, %v1066_v59  ;;  %v969_v54 = vadd.f32 %v958_v12, %v941_v3  ;;  %v1057_v26 = vrot.slane %v1049_v14, 2  ;;  %v1030_v59 = vsel %vm483_vm13, %v1028_v18, %v1029_v31 }
 0x3f5   :  { %v1056_v22 = vrot.slane %v1047_v49, 2  ;;  %v1040_v49 = vadd.f32 %v1030_v59, %v1012_v7  ;;  %vm2275_vm13 = vcmp.lt.s32.totalorder %v1670_v9, 14  ;;  %v1039_v38 = vadd.f32 %v1035_v32, %v1941_v33 }
 0x3f6   :  { %v1142_v21 = vadd.f32 %v1116_v25, %v1094_v51  ;;  %v997_v2 = vadd.f32 %v986_v62, %v969_v54  ;;  %v1061_v34 = vsel %vm532_vm12, %v1057_v26, %v1054_v56  ;;  %vm2276_vm5 = vcmp.lt.s32.totalorder %v1670_v9, 13 }
 0x3f7   :  { %v1077_v17 = vpop.permute.xlu1 %1076  ;;  %v1059_v63 = vsel %vm532_vm12, %v1055_v60, %v1056_v22  ;;  %v1065_v35 = vsel %vm2274_vm6, %v1061_v34, 0.0  ;;  %v1058_v60 = vsel %vm532_vm12, %v1056_v22, %v1057_v26  ;;  %vm1269_vm12 = vcmp.lt.s32.totalorder %v1677_v20, 9 }
 0x3f8   :  { %v1075_v47 = vpop.permute.xlu0 %1074  ;;  %v1190_v48 = vadd.f32 %v1164_v16, %v1142_v21  ;;  %v1013_v28 = vadd.f32 %v1005_v37, %v997_v2  ;;  %v1085_v0 = vrot.slane %v1077_v17, 3  ;;  %v1063_v51 = vsel %vm2275_vm13, %v1059_v63, 0.0 }
 0x3f9   :  { %v1084_v50 = vrot.slane %v1075_v47, 3  ;;  %v1068_v16 = vadd.f32 %v1058_v60, %v1040_v49  ;;  %v1067_v33 = vadd.f32 %v1063_v51, %v1039_v38  ;;  %vm2277_vm6 = vcmp.lt.s32.totalorder %v1677_v20, 13 }
 0x3fa   :  { %v1238_v6 = vadd.f32 %v1212_v4, %v1190_v48  ;;  %v1041_v13 = vadd.f32 %v1037_v61, %v1013_v28  ;;  %v1089_v25 = vsel %vm581_vm14, %v1085_v0, %v1082_v57 }
 0x3fb   :  { %v1105_v5 = vpop.permute.xlu1 %1104  ;;  %v1087_v12 = vsel %vm581_vm14, %v1083_v53, %v1084_v50  ;;  %v1086_v53 = vsel %vm581_vm14, %v1084_v50, %v1085_v0  ;;  %v1093_v17 = vsel %vm2277_vm6, %v1089_v25, 0.0 }
 0x3fc   :  { %v1103_v37 = vpop.permute.xlu0 %1102  ;;  %v2145_v55 = vadd.f32 %v1260_v27, %v1238_v6  ;;  %v1113_v8 = vrot.slane %v1105_v5, 4  ;;  %v1069_v36 = vadd.f32 %v1065_v35, %v1041_v13  ;;  %v1091_v57 = vsel %vm2276_vm5, %v1087_v12, 0.0 }
 0x3fd   :  { %v1112_v56 = vrot.slane %v1103_v37, 4  ;;  %v1096_v26 = vadd.f32 %v1086_v53, %v1068_v16  ;;  %v1095_v48 = vadd.f32 %v1091_v57, %v1067_v33 }
 0x3fe   :  { %v1291_v3 = vsel %vm1290_vm8, %v2145_v55, -inf  ;;  %v1117_v18 = vsel %vm881_vm1, %v1113_v8, %v1110_v52  ;;  %v1097_v30 = vadd.f32 %v1093_v17, %v1069_v36 }
 0x3ff   :  { %v1153_v14 = vpop.permute.xlu1 %1152  ;;  %1292 = vmax.xlane.f32.xlu0 %v1291_v3  ;;  %v1115_v54 = vsel %vm881_vm1, %v1111_v58, %v1112_v56  ;;  %v1114_v39 = vsel %vm881_vm1, %v1112_v56, %v1113_v8  ;;  %v1141_v4 = vsel %vm1125_vm10, %v1117_v18, 0.0 }
 0x400   :  { %v1161_v62 = vrot.slane %v1153_v14, 5  ;;  %v1151_v31 = vpop.permute.xlu0 %1150  ;;  %v1139_v40 = vsel %vm1123_vm15, %v1115_v54, 0.0  ;;  %v1144_v28 = vadd.f32 %v1114_v39, %v1096_v26  ;;  %v1145_v34 = vadd.f32 %v1141_v4, %v1097_v30 }
 0x401   :  { %v1160_v21 = vrot.slane %v1151_v31, 5 }
 0x402   :  { %v1165_v52 = vsel %vm316_vm3, %v1161_v62, %v1158_v10  ;;  %v1143_v10 = vadd.f32 %v1139_v40, %v1095_v48 }
 0x403   :  { %v1163_v58 = vsel %vm316_vm3, %v1159_v15, %v1160_v21  ;;  %v1201_v2 = vpop.permute.xlu1 %1200  ;;  %v1162_v41 = vsel %vm316_vm3, %v1160_v21, %v1161_v62  ;;  %v1189_v50 = vsel %vm1173_vm4, %v1165_v52, 0.0  ;;  %vm1267_vm3 = vcmp.lt.s32.totalorder %v1670_v9, 9 }
 0x404   :  { %v1209_v47 = vrot.slane %v1201_v2, 6  ;;  %v1199_v22 = vpop.permute.xlu0 %1198  ;;  %v1187_v23 = vsel %vm1171_vm0, %v1163_v58, 0.0  ;;  %v1192_v0 = vadd.f32 %v1162_v41, %v1144_v28  ;;  %v1193_v43 = vadd.f32 %v1189_v50, %v1145_v34 }
 0x405   :  { %v1208_v15 = vrot.slane %v1199_v22, 6  ;;  %v1191_v61 = vadd.f32 %v1187_v23, %v1143_v10 }
 0x406   :  { %v1213_v42 = vsel %vm369_vm9, %v1209_v47, %v1206_v19 }
 0x407   :  { %v1210_v5 = vsel %vm369_vm9, %v1208_v15, %v1209_v47  ;;  %v1211_v6 = vsel %vm369_vm9, %v1207_v1, %v1208_v15  ;;  %v1249_v7 = vpop.permute.xlu1 %1248  ;;  %v1237_v63 = vsel %vm1221_vm7, %v1213_v42, 0.0 }
 0x408   :  { %v1257_v37 = vrot.slane %v1249_v7, 7  ;;  %v1247_v44 = vpop.permute.xlu0 %1246  ;;  %v1235_v19 = vsel %vm1219_vm2, %v1211_v6, 0.0  ;;  %v1240_v56 = vadd.f32 %v1210_v5, %v1192_v0  ;;  %v1241_v60 = vadd.f32 %v1237_v63, %v1193_v43 }
 0x409   :  { %v1256_v27 = vrot.slane %v1247_v44, 7  ;;  %v1239_v13 = vadd.f32 %v1235_v19, %v1191_v61 }
 0x40a   :  { %v1261_v1 = vsel %vm418_vm11, %v1257_v37, %v1254_v11 }
 0x40b   :  { %v1258_v32 = vsel %vm418_vm11, %v1256_v27, %v1257_v37  ;;  %v1259_v59 = vsel %vm418_vm11, %v1255_v24, %v1256_v27  ;;  %v1285_v9 = vsel %vm1269_vm12, %v1261_v1, 0.0 }
 0x40c   :  { %v1288_v8 = vadd.f32 %v1258_v32, %v1240_v56  ;;  %v1283_v35 = vsel %vm1267_vm3, %v1259_v59, 0.0  ;;  %v1289_v14 = vadd.f32 %v1285_v9, %v1241_v60 }
 0x40d   :  { %v1287_v12 = vadd.f32 %v1283_v35, %v1239_v13 }
 0x40e   :  { %v1297_v46 = vsel %vm1290_vm8, %v1288_v8, -inf  ;;  %v1300_v3 = vsel %vm1290_vm8, %v1289_v14, -inf }
 0x40f   :  { %1298 = vmax.xlane.f32.xlu0 %v1297_v46  ;;  %v1294_v11 = vsel %vm1290_vm8, %v1287_v12, -inf }
 0x410   :  { %1295 = vmax.xlane.f32.xlu1 %v1294_v11 }
 0x413   :  { %1301 = vmax.xlane.f32.xlu0 %v1300_v3 }
 0x48c   :  { %v1293_v45 = vpop.xlane.xlu0 %1292 }
 0x48d   :  { %v1303_v29 = vsub.f32 %v2145_v55, %v1293_v45 }
 0x48f   :  { %v1307_v24 = vmul.f32 1.442695, %v1303_v29 }
 0x491   :  { %1463 = vpow2.f32 %v1307_v24 }
 0x49b   :  { %v1464_v20 = vpop.eup %1463 }
 0x49c   :  { %v1299_v49 = vpop.xlane.xlu0 %1298  ;;  %v1315_v62 = vsel %vm1290_vm8, %v1464_v20, 0.0 }
 0x49d   :  { %v1305_v51 = vsub.f32 %v1288_v8, %v1299_v49  ;;  %v1296_v25 = vpop.xlane.xlu1 %1295  ;;  %1316 = vadd.xlane.f32.xlu1 %v1315_v62 }
 0x49e   :  { %v1304_v31 = vsub.f32 %v1287_v12, %v1296_v25 }
 0x49f   :  { %v1311_v38 = vmul.f32 1.442695, %v1305_v51 }
 0x4a0   :  { %v1309_v53 = vmul.f32 1.442695, %v1304_v31  ;;  %v1302_v54 = vpop.xlane.xlu0 %1301 }
 0x4a1   :  { %1465 = vpow2.f32 %v1311_v38  ;;  %v1306_v21 = vsub.f32 %v1289_v14, %v1302_v54 }
 0x4a2   :  { %1467 = vpow2.f32 %v1309_v53 }
 0x4a3   :  { %v1313_v36 = vmul.f32 1.442695, %v1306_v21 }
 0x4a5   :  { %1469 = vpow2.f32 %v1313_v36 }
 0x4ab   :  { %v1466_v16 = vpop.eup %1465 }
 0x4ac   :  { %v1468_v55 = vpop.eup %1467  ;;  %v1321_v57 = vsel %vm1290_vm8, %v1466_v16, 0.0 }
 0x4ad   :  { %1322 = vadd.xlane.f32.xlu1 %v1321_v57  ;;  %v1318_v18 = vsel %vm1290_vm8, %v1468_v55, 0.0 }
 0x4ae   :  { %1319 = vadd.xlane.f32.xlu0 %v1318_v18 }
 0x4af   :  { %v1470_v33 = vpop.eup %1469 }
 0x4b0   :  { %v1324_v17 = vsel %vm1290_vm8, %v1470_v33, 0.0 }
 0x4b2   :  { %1325 = vadd.xlane.f32.xlu0 %v1324_v17 }
 0x52a   :  { %v1317_v39 = vpop.xlane.xlu1 %1316 }
 0x52b   :  { %1471 = vlog2.f32 %v1317_v39 }
 0x535   :  { %v1472_v58 = vpop.eup %1471 }
 0x536   :  { %v1328_v2 = vmul.f32 0.6931472, %v1472_v58 }
 0x538   :  { %v1335_v26 = vsub.f32 %v1303_v29, %v1328_v2 }
 0x53a   :  { %v1323_v40 = vpop.xlane.xlu1 %1322  ;;  %1339 = vst.msk [vmem:[%s2263_s7] sm:$0xff] %vm1290_vm8, %v1335_v26 }
 0x53b   :  { %1473 = vlog2.f32 %v1323_v40  ;;  %v1320_v52 = vpop.xlane.xlu0 %1319 }
 0x53c   :  { %1475 = vlog2.f32 %v1320_v52 }
 0x53f   :  { %v1326_v47 = vpop.xlane.xlu0 %1325 }
 0x540   :  { %1477 = vlog2.f32 %v1326_v47 }
 0x545   :  { %v1474_v22 = vpop.eup %1473 }
 0x546   :  { %v1476_v48 = vpop.eup %1475  ;;  %v1332_v4 = vmul.f32 0.6931472, %v1474_v22 }
 0x547   :  { %v1330_v41 = vmul.f32 0.6931472, %v1476_v48 }
 0x548   :  { %v1337_v15 = vsub.f32 %v1305_v51, %v1332_v4 }
 0x549   :  { %v1336_v30 = vsub.f32 %v1304_v31, %v1330_v41 }
 0x54a   :  { %v1478_v28 = vpop.eup %1477  ;;  %1341 = vst.msk [vmem:[%s2263_s7 + $0x10] sm:$0xff] %vm1290_vm8, %v1337_v15 }
 0x54b   :  { %1340 = vst.msk [vmem:[%s2263_s7 + $0x8] sm:$0xff] %vm1290_vm8, %v1336_v30  ;;  %v1334_v23 = vmul.f32 0.6931472, %v1478_v28 }
 0x54d   :  { %v1338_v42 = vsub.f32 %v1306_v21, %v1334_v23 }
 0x54f   :  { %1342 = vst.msk [vmem:[%s2263_s7 + $0x18] sm:$0xff] %vm1290_vm8, %v1338_v42 }

</bundles_post_ra>
